<compile_context>
chip_gen: v6e
topology: v6e:2x2x1
jax: 0.10.0
libtpu: 0.0.40
codegen_flags: <defaults>
</compile_context>

<pallas_src>
import jax
import jax.numpy as jnp
from jax.experimental import pallas as pl
from jax.experimental.pallas import tpu as pltpu


_HEAD_C = 8  # padded head channels: [score, size_w, size_h, off_x, off_y, pad, pad, pad]


# ----------------------------------------------------------------------------
# Fused kernel: (template -> K/V) + (search embed) + cross-attn (+residual)
#               per modality -> fusion add -> CENTER head.  One batch element
#               per grid step; all intermediates stay in VMEM/vregs.
# ----------------------------------------------------------------------------
def _mcit_fused_kernel(t_rgb_ref, t_aux_ref,     # (1, Cp, Nt)  templates, channel-first, bf16
                       s_rgb_ref, s_aux_ref,     # (1, Ns, Cp)  search, token-major, bf16
                       w_ref,                    # (208, D)     packed bf16 weight blob
                       out_ref,                  # (1, 8, Ns)   f32, channel-first lane-dense
                       fuse_ref):                # VMEM scratch (Ns, D) f32
    cp = t_rgb_ref.shape[1]     # padded channel dim (includes constant-1 bias channel)
    d = w_ref.shape[1]          # embedding dim

    # Static row offsets into the packed blob (all 8-row aligned).
    o_tmpl_rgb = 0
    o_tmpl_aux = 2 * d
    o_emb_rgb = 4 * d
    o_emb_aux = 4 * d + cp
    o_head = 4 * d + 2 * cp     # 16 rows: [Wh (8, D) ; bh in lane 0 (8, D)]

    def stream(t_cf, s_tok_in, w_tmpl, w_emb):
        # Template path: kv = [scale*Wq@Wk^T ; Wv^T] @ (We^T t + b)
        # (embedding + K/V + scale all pre-folded into w_tmpl; bias via const-1 channel)
        kv = jnp.dot(w_tmpl, t_cf, preferred_element_type=jnp.float32)        # (2D, Nt)
        wqk_t = kv[:d, :].astype(jnp.bfloat16)                                # (D, Nt)
        v_t = kv[d:, :].astype(jnp.bfloat16)                                  # (D, Nt)

        # Search embedding (bias folded via const-1 channel): one MXU matmul.
        s_tok = jnp.dot(s_tok_in, w_emb, preferred_element_type=jnp.float32)  # (Ns, D)

        # Cross-attention (1/sqrt(D) already folded into wqk_t).
        logits = jnp.dot(s_tok.astype(jnp.bfloat16), wqk_t,
                         preferred_element_type=jnp.float32)                  # (Ns, Nt)
        m = jnp.max(logits, axis=-1, keepdims=True)
        p = jnp.exp(logits - m)
        attn = p * pl.reciprocal(jnp.sum(p, axis=-1, keepdims=True), approx=True)
        ctx = jax.lax.dot_general(attn.astype(jnp.bfloat16), v_t,             # attn @ v  -> (Ns, D)
                                  dimension_numbers=(((1,), (1,)), ((), ())),
                                  preferred_element_type=jnp.float32)
        return s_tok + ctx                                                    # residual

    out_rgb = stream(t_rgb_ref[0], s_rgb_ref[0],
                     w_ref[o_tmpl_rgb:o_tmpl_rgb + 2 * d, :],
                     w_ref[o_emb_rgb:o_emb_rgb + cp, :])
    fuse_ref[...] = out_rgb                      # park rgb result in VMEM (bound live vregs)

    out_aux = stream(t_aux_ref[0], s_aux_ref[0],
                     w_ref[o_tmpl_aux:o_tmpl_aux + 2 * d, :],
                     w_ref[o_emb_aux:o_emb_aux + cp, :])
    fusion = out_aux + fuse_ref[...]                                          # (Ns, D)

    # CENTER head: channel-first, lane-dense (8, Ns).
    head_blk = w_ref[o_head:o_head + 2 * _HEAD_C, :]                          # aligned 16-row load
    w_head = head_blk[:_HEAD_C, :]                                            # (8, D) bf16
    b_head = head_blk[_HEAD_C:, 0:1].astype(jnp.float32)                      # (8, 1)
    h = jax.lax.dot_general(w_head, fusion.astype(jnp.bfloat16),
                            dimension_numbers=(((1,), (1,)), ((), ())),
                            preferred_element_type=jnp.float32) + b_head      # (8, Ns)
    out_ref[0] = jnp.clip(jax.nn.sigmoid(h), 1e-4, 1.0 - 1e-4)


def mcit_fused(t_rgb_p, t_aux_p, s_rgb_p, s_aux_p, blob):
    b, cp, nt = t_rgb_p.shape
    _, ns, _ = s_rgb_p.shape
    rows, d = blob.shape

    return pl.pallas_call(
        _mcit_fused_kernel,
        out_shape=jax.ShapeDtypeStruct((b, _HEAD_C, ns), jnp.float32),
        grid=(b,),
        in_specs=[
            pl.BlockSpec((1, cp, nt), lambda i: (i, 0, 0)),
            pl.BlockSpec((1, cp, nt), lambda i: (i, 0, 0)),
            pl.BlockSpec((1, ns, cp), lambda i: (i, 0, 0)),
            pl.BlockSpec((1, ns, cp), lambda i: (i, 0, 0)),
            pl.BlockSpec((rows, d), lambda i: (0, 0)),     # weight blob, DMA'd once
        ],
        out_specs=pl.BlockSpec((1, _HEAD_C, ns), lambda i: (i, 0, 0)),
        scratch_shapes=[pltpu.VMEM((ns, d), jnp.float32)],
        compiler_params=pltpu.CompilerParams(dimension_semantics=("parallel",)),
    )(t_rgb_p, t_aux_p, s_rgb_p, s_aux_p, blob)


# ----------------------------------------------------------------------------
# Parameter init (deterministic, synthetic) — same layout as before.
# ----------------------------------------------------------------------------
def init_params(key, cin, d):
    def stream_params(k):
        k = jax.random.split(k, 5)
        return {
            "w_embed": jax.random.normal(k[0], (cin, d), jnp.float32) * 0.1,
            "b_embed": jnp.zeros((d,), jnp.float32),
            "wq": jax.random.normal(k[1], (d, d), jnp.float32) * 0.1,
            "wk": jax.random.normal(k[2], (d, d), jnp.float32) * 0.1,
            "wv": jax.random.normal(k[3], (d, d), jnp.float32) * 0.1,
        }

    k_rgb, k_aux, k_head = jax.random.split(key, 3)
    kh = jax.random.split(k_head, 2)
    return {
        "rgb": stream_params(k_rgb),
        "aux": stream_params(k_aux),
        "w_head": jax.random.normal(kh[0], (d, 5), jnp.float32) * 0.1,
        "b_head": jax.random.normal(kh[1], (5,), jnp.float32) * 0.1,
    }


# ----------------------------------------------------------------------------
# One-time weight prep: algebraic folds + bf16 cast + pack into a single blob.
# ----------------------------------------------------------------------------
def prepare_weights(params, cin, cp):
    d = params["w_head"].shape[0]
    assert cp == d and cp > cin, "this packing uses cp == d and a constant-1 bias channel"
    scale = 1.0 / jnp.sqrt(jnp.float32(d))

    def tmpl_block(p):
        # [scale * Wq @ Wk^T ; Wv^T] @ We^T, with the embedding bias folded into the
        # constant-1 channel column (homogeneous-coordinate trick).
        w_big = jnp.concatenate([(p["wq"] @ p["wk"].T) * scale, p["wv"].T], axis=0)   # (2D, D)
        blk = jnp.zeros((2 * d, cp), jnp.float32)
        blk = blk.at[:, :cin].set(w_big @ p["w_embed"].T)                             # (2D, Cin)
        blk = blk.at[:, cin].set(w_big @ p["b_embed"])
        return blk

    def emb_block(p):
        blk = jnp.zeros((cp, d), jnp.float32)
        blk = blk.at[:cin, :].set(p["w_embed"])
        blk = blk.at[cin, :].set(p["b_embed"])
        return blk

    wh = jnp.zeros((_HEAD_C, d), jnp.float32).at[:5].set(params["w_head"].T)
    bh = jnp.zeros((_HEAD_C, d), jnp.float32).at[:5, 0].set(params["b_head"])

    blob = jnp.concatenate(
        [tmpl_block(params["rgb"]), tmpl_block(params["aux"]),
         emb_block(params["rgb"]), emb_block(params["aux"]),
         wh, bh], axis=0)                                                             # (208, D)
    return blob.astype(jnp.bfloat16)


# ----------------------------------------------------------------------------
# MCIT forward (head_type == 'CENTER')
# ----------------------------------------------------------------------------
def mcit_forward(data, blob):
    t_rgb = data["template_rgb_images"].astype(jnp.float32)
    t_aux = data["template_aux_images"].astype(jnp.float32)
    s_rgb = data["search_rgb_images"].astype(jnp.float32)
    s_aux = data["search_aux_images"].astype(jnp.float32)

    b, cin, ht, wt = t_rgb.shape
    _, _, hs, ws = s_rgb.shape
    cp = blob.shape[1]          # padded channel dim (== D); channel `cin` is the constant-1 bias

    def prep_template(t):       # NCHW -> (B, Cp, Nt) bf16, channel-first: [data, 1, 0...]
        n = t.shape[2] * t.shape[3]
        t = t.reshape(b, cin, n)
        ones = jnp.ones((b, 1, n), jnp.float32)
        zeros = jnp.zeros((b, cp - cin - 1, n), jnp.float32)
        return jnp.concatenate([t, ones, zeros], axis=1).astype(jnp.bfloat16)

    def prep_search(s):         # NCHW -> (B, Ns, Cp) bf16, token-major: [data, 1, 0...]
        n = s.shape[2] * s.shape[3]
        s = jnp.transpose(s.reshape(b, cin, n), (0, 2, 1))
        ones = jnp.ones((b, n, 1), jnp.float32)
        zeros = jnp.zeros((b, n, cp - cin - 1), jnp.float32)
        return jnp.concatenate([s, ones, zeros], axis=2).astype(jnp.bfloat16)

    head_out = mcit_fused(prep_template(t_rgb), prep_template(t_aux),
                          prep_search(s_rgb), prep_search(s_aux), blob)    # (B, 8, Ns)

    # Maps come out channel-first & lane-dense -> NCHW is just a reshape.
    maps = head_out.reshape(b, _HEAD_C, hs, ws)
    score_map = maps[:, 0:1]
    size_map = maps[:, 1:3]
    offset_map = maps[:, 3:5]

    # pred_boxes from the score-map argmax (tiny scalar glue, plain JAX).
    idx = jnp.argmax(head_out[:, 0, :], axis=1)                            # (B,)
    idx_y = (idx // ws).astype(jnp.float32)
    idx_x = (idx % ws).astype(jnp.float32)
    sel = jnp.take_along_axis(head_out, idx[:, None, None], axis=2)[:, :, 0]
    cx = (idx_x + sel[:, 3]) / ws
    cy = (idx_y + sel[:, 4]) / hs
    pred_boxes = jnp.stack([cx, cy, sel[:, 1], sel[:, 2]], axis=1)[:, None, :]

    return {
        "score_map": score_map,
        "pred_boxes": pred_boxes,
        "size_map": size_map,
        "offset_map": offset_map,
    }


if __name__ == "__main__":
    key = jax.random.PRNGKey(0)
    k_params, k_trgb, k_taux, k_srgb, k_saux = jax.random.split(key, 5)

    B, CIN, D = 2, 3, 32
    HT = WT = 8       # template spatial
    HS = WS = 16      # search spatial

    data = {
        "template_rgb_images": jax.random.normal(k_trgb, (B, CIN, HT, WT), jnp.float32),
        "template_aux_images": jax.random.normal(k_taux, (B, CIN, HT, WT), jnp.float32),
        "search_rgb_images": jax.random.normal(k_srgb, (B, CIN, HS, WS), jnp.float32),
        "search_aux_images": jax.random.normal(k_saux, (B, CIN, HS, WS), jnp.float32),
    }
    params = init_params(k_params, CIN, D)
    blob = prepare_weights(params, CIN, cp=D)   # one-time weight fold/pack/cast

    fwd = jax.jit(mcit_forward)
    out = fwd(data, blob)
    jax.block_until_ready(out)

    assert out["score_map"].shape == (B, 1, HS, WS)
    assert out["size_map"].shape == (B, 2, HS, WS)
    assert out["offset_map"].shape == (B, 2, HS, WS)
    assert out["pred_boxes"].shape == (B, 1, 4)
    print("KERNEL_OK")
</pallas_src>

<mosaic_0001>
module attributes {stable_mosaic.version = 11 : i64} {
  func.func @_mcit_fused_kernel(%arg0: i32, %arg1: memref<1x32x64xbf16, #tpu.memory_space<vmem>>, %arg2: memref<1x32x64xbf16, #tpu.memory_space<vmem>>, %arg3: memref<1x256x32xbf16, #tpu.memory_space<vmem>>, %arg4: memref<1x256x32xbf16, #tpu.memory_space<vmem>>, %arg5: memref<208x32xbf16, #tpu.memory_space<vmem>>, %arg6: memref<1x8x256xf32, #tpu.memory_space<vmem>>, %arg7: memref<256x32xf32, #tpu.memory_space<vmem>>) attributes {dimension_semantics = [#tpu.dimension_semantics<parallel>], iteration_bounds = array<i64: 2>, scalar_prefetch = 0 : i64, scratch_operands = 1 : i64, tpu.core_type = #tpu.core_type<tc>, window_params = [{transform_indices = @transform_0, window_bounds = array<i64: 1, 32, 64>}, {transform_indices = @transform_1, window_bounds = array<i64: 1, 32, 64>}, {transform_indices = @transform_2, window_bounds = array<i64: 1, 256, 32>}, {transform_indices = @transform_3, window_bounds = array<i64: 1, 256, 32>}, {pipeline_mode = #tpu.pipeline_mode<synchronous>, transform_indices = @transform_4, window_bounds = array<i64: 208, 32>}, {transform_indices = @transform_5, window_bounds = array<i64: 1, 8, 256>}]} {
    %c0 = arith.constant 0 : index
    %c0_0 = arith.constant 0 : index
    %c0_1 = arith.constant 0 : index
    %0 = vector.load %arg1[%c0, %c0_0, %c0_1] : memref<1x32x64xbf16, #tpu.memory_space<vmem>>, vector<1x32x64xbf16>
    %1 = vector.shape_cast %0 : vector<1x32x64xbf16> to vector<32x64xbf16>
    %c0_2 = arith.constant 0 : index
    %c0_3 = arith.constant 0 : index
    %c0_4 = arith.constant 0 : index
    %2 = vector.load %arg3[%c0_2, %c0_3, %c0_4] : memref<1x256x32xbf16, #tpu.memory_space<vmem>>, vector<1x256x32xbf16>
    %3 = vector.shape_cast %2 : vector<1x256x32xbf16> to vector<256x32xbf16>
    %c0_5 = arith.constant 0 : index
    %c0_6 = arith.constant 0 : index
    %4 = vector.load %arg5[%c0_5, %c0_6] : memref<208x32xbf16, #tpu.memory_space<vmem>>, vector<64x32xbf16>
    %c128 = arith.constant 128 : index
    %c0_7 = arith.constant 0 : index
    %5 = vector.load %arg5[%c128, %c0_7] : memref<208x32xbf16, #tpu.memory_space<vmem>>, vector<32x32xbf16>
    %cst = arith.constant dense<0.000000e+00> : vector<64x64xf32>
    %6 = tpu.matmul %4, %1, %cst {dimension_numbers = #tpu.dot_dimension_numbers<[1], [0], [0], [1], [0, 0, 1, 1], [], []>} : vector<64x32xbf16>, vector<32x64xbf16>, vector<64x64xf32> -> vector<64x64xf32>
    %7 = vector.extract_strided_slice %6 {offsets = [0, 0], sizes = [32, 64], strides = [1, 1]} : vector<64x64xf32> to vector<32x64xf32>
    %8 = arith.truncf %7 : vector<32x64xf32> to vector<32x64xbf16>
    %9 = vector.extract_strided_slice %6 {offsets = [32, 0], sizes = [32, 64], strides = [1, 1]} : vector<64x64xf32> to vector<32x64xf32>
    %10 = arith.truncf %9 : vector<32x64xf32> to vector<32x64xbf16>
    %cst_8 = arith.constant dense<0.000000e+00> : vector<256x32xf32>
    %11 = tpu.matmul %3, %5, %cst_8 {dimension_numbers = #tpu.dot_dimension_numbers<[1], [0], [0], [1], [0, 0, 1, 1], [], []>} : vector<256x32xbf16>, vector<32x32xbf16>, vector<256x32xf32> -> vector<256x32xf32>
    %12 = arith.truncf %11 : vector<256x32xf32> to vector<256x32xbf16>
    %cst_9 = arith.constant dense<0.000000e+00> : vector<256x64xf32>
    %13 = tpu.matmul %12, %8, %cst_9 {dimension_numbers = #tpu.dot_dimension_numbers<[1], [0], [0], [1], [0, 0, 1, 1], [], []>} : vector<256x32xbf16>, vector<32x64xbf16>, vector<256x64xf32> -> vector<256x64xf32>
    %cst_10 = arith.constant dense<0xFF800000> : vector<256xf32>
    %14 = vector.multi_reduction <maximumf>, %13, %cst_10 [1] : vector<256x64xf32> to vector<256xf32>
    %15 = vector.shape_cast %14 : vector<256xf32> to vector<256x1xf32>
    %16 = vector.broadcast %15 : vector<256x1xf32> to vector<256x64xf32>
    %17 = arith.subf %13, %16 : vector<256x64xf32>
    %18 = math.exp %17 : vector<256x64xf32>
    %cst_11 = arith.constant dense<0.000000e+00> : vector<256xf32>
    %19 = vector.multi_reduction <add>, %18, %cst_11 [1] : vector<256x64xf32> to vector<256xf32>
    %20 = vector.shape_cast %19 : vector<256xf32> to vector<256x1xf32>
    %21 = tpu.reciprocal %20 {approx = true} : vector<256x1xf32> -> vector<256x1xf32>
    %22 = vector.broadcast %21 : vector<256x1xf32> to vector<256x64xf32>
    %23 = arith.mulf %18, %22 : vector<256x64xf32>
    %24 = arith.truncf %23 : vector<256x64xf32> to vector<256x64xbf16>
    %cst_12 = arith.constant dense<0.000000e+00> : vector<256x32xf32>
    %25 = tpu.matmul %24, %10, %cst_12 {dimension_numbers = #tpu.dot_dimension_numbers<[1], [1], [0], [0], [0, 0, 1, 0], [], []>} : vector<256x64xbf16>, vector<32x64xbf16>, vector<256x32xf32> -> vector<256x32xf32>
    %26 = arith.addf %11, %25 : vector<256x32xf32>
    %c0_13 = arith.constant 0 : index
    %c0_14 = arith.constant 0 : index
    %27 = vector.load %arg7[%c0_13, %c0_14] : memref<256x32xf32, #tpu.memory_space<vmem>>, vector<256x32xf32>
    tpu.vector_store %arg7[%c0_13, %c0_14], %26 {strides = array<i32>} : memref<256x32xf32, #tpu.memory_space<vmem>>, vector<256x32xf32>,
    %c0_15 = arith.constant 0 : index
    %c0_16 = arith.constant 0 : index
    %c0_17 = arith.constant 0 : index
    %28 = vector.load %arg2[%c0_15, %c0_16, %c0_17] : memref<1x32x64xbf16, #tpu.memory_space<vmem>>, vector<1x32x64xbf16>
    %29 = vector.shape_cast %28 : vector<1x32x64xbf16> to vector<32x64xbf16>
    %c0_18 = arith.constant 0 : index
    %c0_19 = arith.constant 0 : index
    %c0_20 = arith.constant 0 : index
    %30 = vector.load %arg4[%c0_18, %c0_19, %c0_20] : memref<1x256x32xbf16, #tpu.memory_space<vmem>>, vector<1x256x32xbf16>
    %31 = vector.shape_cast %30 : vector<1x256x32xbf16> to vector<256x32xbf16>
    %c64 = arith.constant 64 : index
    %c0_21 = arith.constant 0 : index
    %32 = vector.load %arg5[%c64, %c0_21] : memref<208x32xbf16, #tpu.memory_space<vmem>>, vector<64x32xbf16>
    %c160 = arith.constant 160 : index
    %c0_22 = arith.constant 0 : index
    %33 = vector.load %arg5[%c160, %c0_22] : memref<208x32xbf16, #tpu.memory_space<vmem>>, vector<32x32xbf16>
    %cst_23 = arith.constant dense<0.000000e+00> : vector<64x64xf32>
    %34 = tpu.matmul %32, %29, %cst_23 {dimension_numbers = #tpu.dot_dimension_numbers<[1], [0], [0], [1], [0, 0, 1, 1], [], []>} : vector<64x32xbf16>, vector<32x64xbf16>, vector<64x64xf32> -> vector<64x64xf32>
    %35 = vector.extract_strided_slice %34 {offsets = [0, 0], sizes = [32, 64], strides = [1, 1]} : vector<64x64xf32> to vector<32x64xf32>
    %36 = arith.truncf %35 : vector<32x64xf32> to vector<32x64xbf16>
    %37 = vector.extract_strided_slice %34 {offsets = [32, 0], sizes = [32, 64], strides = [1, 1]} : vector<64x64xf32> to vector<32x64xf32>
    %38 = arith.truncf %37 : vector<32x64xf32> to vector<32x64xbf16>
    %cst_24 = arith.constant dense<0.000000e+00> : vector<256x32xf32>
    %39 = tpu.matmul %31, %33, %cst_24 {dimension_numbers = #tpu.dot_dimension_numbers<[1], [0], [0], [1], [0, 0, 1, 1], [], []>} : vector<256x32xbf16>, vector<32x32xbf16>, vector<256x32xf32> -> vector<256x32xf32>
    %40 = arith.truncf %39 : vector<256x32xf32> to vector<256x32xbf16>
    %cst_25 = arith.constant dense<0.000000e+00> : vector<256x64xf32>
    %41 = tpu.matmul %40, %36, %cst_25 {dimension_numbers = #tpu.dot_dimension_numbers<[1], [0], [0], [1], [0, 0, 1, 1], [], []>} : vector<256x32xbf16>, vector<32x64xbf16>, vector<256x64xf32> -> vector<256x64xf32>
    %cst_26 = arith.constant dense<0xFF800000> : vector<256xf32>
    %42 = vector.multi_reduction <maximumf>, %41, %cst_26 [1] : vector<256x64xf32> to vector<256xf32>
    %43 = vector.shape_cast %42 : vector<256xf32> to vector<256x1xf32>
    %44 = vector.broadcast %43 : vector<256x1xf32> to vector<256x64xf32>
    %45 = arith.subf %41, %44 : vector<256x64xf32>
    %46 = math.exp %45 : vector<256x64xf32>
    %cst_27 = arith.constant dense<0.000000e+00> : vector<256xf32>
    %47 = vector.multi_reduction <add>, %46, %cst_27 [1] : vector<256x64xf32> to vector<256xf32>
    %48 = vector.shape_cast %47 : vector<256xf32> to vector<256x1xf32>
    %49 = tpu.reciprocal %48 {approx = true} : vector<256x1xf32> -> vector<256x1xf32>
    %50 = vector.broadcast %49 : vector<256x1xf32> to vector<256x64xf32>
    %51 = arith.mulf %46, %50 : vector<256x64xf32>
    %52 = arith.truncf %51 : vector<256x64xf32> to vector<256x64xbf16>
    %cst_28 = arith.constant dense<0.000000e+00> : vector<256x32xf32>
    %53 = tpu.matmul %52, %38, %cst_28 {dimension_numbers = #tpu.dot_dimension_numbers<[1], [1], [0], [0], [0, 0, 1, 0], [], []>} : vector<256x64xbf16>, vector<32x64xbf16>, vector<256x32xf32> -> vector<256x32xf32>
    %54 = arith.addf %39, %53 : vector<256x32xf32>
    %c0_29 = arith.constant 0 : index
    %c0_30 = arith.constant 0 : index
    %55 = vector.load %arg7[%c0_29, %c0_30] : memref<256x32xf32, #tpu.memory_space<vmem>>, vector<256x32xf32>
    %56 = arith.addf %54, %55 : vector<256x32xf32>
    %c192 = arith.constant 192 : index
    %c0_31 = arith.constant 0 : index
    %57 = vector.load %arg5[%c192, %c0_31] : memref<208x32xbf16, #tpu.memory_space<vmem>>, vector<16x32xbf16>
    %58 = vector.extract_strided_slice %57 {offsets = [0, 0], sizes = [8, 32], strides = [1, 1]} : vector<16x32xbf16> to vector<8x32xbf16>
    %59 = vector.extract_strided_slice %57 {offsets = [8, 0], sizes = [8, 1], strides = [1, 1]} : vector<16x32xbf16> to vector<8x1xbf16>
    %60 = arith.extf %59 : vector<8x1xbf16> to vector<8x1xf32>
    %61 = arith.truncf %56 : vector<256x32xf32> to vector<256x32xbf16>
    %cst_32 = arith.constant dense<0.000000e+00> : vector<8x256xf32>
    %62 = tpu.matmul %58, %61, %cst_32 {dimension_numbers = #tpu.dot_dimension_numbers<[1], [1], [0], [0], [0, 0, 1, 0], [], []>} : vector<8x32xbf16>, vector<256x32xbf16>, vector<8x256xf32> -> vector<8x256xf32>
    %63 = vector.broadcast %60 : vector<8x1xf32> to vector<8x256xf32>
    %64 = arith.addf %62, %63 : vector<8x256xf32>
    %65 = arith.negf %64 : vector<8x256xf32>
    %66 = math.exp %65 : vector<8x256xf32>
    %cst_33 = arith.constant 1.000000e+00 : f32
    %67 = vector.broadcast %cst_33 : f32 to vector<8x256xf32>
    %68 = arith.addf %67, %66 : vector<8x256xf32>
    %69 = arith.divf %67, %68 : vector<8x256xf32>
    %cst_34 = arith.constant 9.99999974E-5 : f32
    %cst_35 = arith.constant 0.999899983 : f32
    %70 = vector.broadcast %cst_34 : f32 to vector<8x256xf32>
    %71 = arith.maximumf %70, %69 : vector<8x256xf32>
    %72 = vector.broadcast %cst_35 : f32 to vector<8x256xf32>
    %73 = arith.minimumf %72, %71 : vector<8x256xf32>
    %c0_36 = arith.constant 0 : index
    %c0_37 = arith.constant 0 : index
    %c0_38 = arith.constant 0 : index
    %74 = vector.load %arg6[%c0_36, %c0_37, %c0_38] : memref<1x8x256xf32, #tpu.memory_space<vmem>>, vector<1x8x256xf32>
    %75 = vector.shape_cast %74 : vector<1x8x256xf32> to vector<8x256xf32>
    %76 = vector.shape_cast %73 : vector<8x256xf32> to vector<1x8x256xf32>
    tpu.vector_store %arg6[%c0_36, %c0_37, %c0_38], %76 {strides = array<i32>} : memref<1x8x256xf32, #tpu.memory_space<vmem>>, vector<1x8x256xf32>,
    return
  }
  func.func @transform_0(%arg0: i32) -> (i32, i32, i32) {
    %c0_i32 = arith.constant 0 : i32
    %c0_i32_0 = arith.constant 0 : i32
    %c0_i32_1 = arith.constant 0 : i32
    return %arg0, %c0_i32, %c0_i32_0 : i32, i32, i32
  }
  func.func @transform_1(%arg0: i32) -> (i32, i32, i32) {
    %c0_i32 = arith.constant 0 : i32
    %c0_i32_0 = arith.constant 0 : i32
    %c0_i32_1 = arith.constant 0 : i32
    return %arg0, %c0_i32, %c0_i32_0 : i32, i32, i32
  }
  func.func @transform_2(%arg0: i32) -> (i32, i32, i32) {
    %c0_i32 = arith.constant 0 : i32
    %c0_i32_0 = arith.constant 0 : i32
    %c0_i32_1 = arith.constant 0 : i32
    return %arg0, %c0_i32, %c0_i32_0 : i32, i32, i32
  }
  func.func @transform_3(%arg0: i32) -> (i32, i32, i32) {
    %c0_i32 = arith.constant 0 : i32
    %c0_i32_0 = arith.constant 0 : i32
    %c0_i32_1 = arith.constant 0 : i32
    return %arg0, %c0_i32, %c0_i32_0 : i32, i32, i32
  }
  func.func @transform_4(%arg0: i32) -> (i32, i32) {
    %c0_i32 = arith.constant 0 : i32
    %c0_i32_0 = arith.constant 0 : i32
    %c0_i32_1 = arith.constant 0 : i32
    return %c0_i32, %c0_i32_0 : i32, i32
  }
  func.func @transform_5(%arg0: i32) -> (i32, i32, i32) {
    %c0_i32 = arith.constant 0 : i32
    %c0_i32_0 = arith.constant 0 : i32
    %c0_i32_1 = arith.constant 0 : i32
    return %arg0, %c0_i32, %c0_i32_0 : i32, i32, i32
  }
}

</mosaic_0001>

<bundles_post_ra>
// kernel: mcit_forward.1
= control target key start
LH: loop header
LB: loop body
LE: loop exit
PB: predicated region body
PF: predicated region fallthrough
CT: control target
= control target key end

     0   :  { %s4141_s18 = smov 0   ;;  %s5398_s0 = inlined_call_operand.vmem [shape: bf16[2,32,64], index: 0, kind: input, shape index: {}]   ;;  %s5399_s1 = inlined_call_operand.vmem [shape: bf16[2,32,64], index: 1, kind: input, shape index: {}]   ;;  %s5400_s2 = inlined_call_operand.vmem [shape: bf16[2,256,32], index: 2, kind: input, shape index: {}]   ;;  %s5401_s3 = inlined_call_operand.vmem [shape: bf16[2,256,32], index: 3, kind: input, shape index: {}]   ;;  %s5402_s4 = inlined_call_operand.vmem [shape: bf16[208,32], index: 4, kind: input, shape index: {}]   ;;  %s5403_s5 = inlined_call_operand.vmem [shape: f32[2,8,256], index: 5, kind: output, shape index: {}]  }
   0x1 LB: > { %s3213_s19 = sadd.s32 4294967295, %s4108_s18   ;;  %p3217_p0 = scmp.ge.s32.totalorder %s4108_s18, 1  ;;  %s4108_s18 = sphi %s4141_s18, %s15_s18  }
   0x2   : > { %p217_p1 = scmp.lt.s32.totalorder %s4108_s18, 3 }
   0x4   : > { %p218_p2 = pnand %p3217_p0, %p217_p1 }
   0x6   : > { %221 = sbr.rel (%p218_p2) target bundleno = 1900 (0x76c), region = 40 }
   0xb   : > { %p260_p3 = scmp.lt.s32.totalorder %s3213_s19, 1  ;;  %v3792_v0 = vld [vmem:[%s5402_s4] sm:$0xff]   ;;  %vm366_vm0 = vcmask 261120   ;;  %v3794_v3 = vld [vmem:[%s5402_s4 + $0x48] sm:$0xff]   ;;  %v3795_v5 = vld [vmem:[%s5402_s4 + $0x10] sm:$0xff]   ;;  %vm974_vm1 = vcmask 523264  }
   0xc   : > { %3532 = vmatprep.mubr.msk.bf16.mxu1 %vm366_vm0, %v3792_v0  ;;  %v3793_v4 = vld [vmem:[%s5402_s4 + $0x8] sm:$0xff]   ;;  %v3797_v6 = vld [vmem:[%s5402_s4 + $0x40] sm:$0xff]   ;;  %v3796_v7 = vld [vmem:[%s5402_s4 + $0x18] sm:$0xff]  }
   0xd   : > { %s5507_s19 = smov (!%p260_p3, %s3213_s19), 1 }
   0xe   : > { %s4153_s22 = sshll.u32 %s5507_s19, 4  ;;  %s3387_s23 = sshll.u32 %s5507_s19, 7 }
   0xf   : > { %s264_s26 = scalar_lea.vmem %s5398_s0, %s4153_s22  ;;  %s4162_s29 = scalar_lea.vmem %s5400_s2, %s3387_s23 }
  0x10   : > { %v3790_v1 = vld [vmem:[%s264_s26 + $0x8] sm:$0xff]   ;;  %v3791_v2 = vld [vmem:[%s264_s26] sm:$0xff]   ;;  %s4188_s17 = scalar_lea.vmem %s5401_s3, %s3387_s23  ;;  %v3800_v10 = vld [vmem:[%s4162_s29 + $0x10] sm:$0xff]   ;;  %s269_s21 = scalar_lea.vmem %s5399_s1, %s4153_s22 }
  0x11   : > { %3528 = vmatprep.subr.bf16.mxu1 %v3790_v1  ;;  %v3798_v8 = vld [vmem:[%s4162_s29] sm:$0xff]   ;;  %v3799_v9 = vld [vmem:[%s4162_s29 + $0x8] sm:$0xff]   ;;  %v3801_v11 = vld [vmem:[%s4162_s29 + $0x18] sm:$0xff]   ;;  %s284_s16 = scalar_lea.vmem %s5403_s5, %s4153_s22 }
  0x12   : > { %3529 = vmatpush3.bf16.msra.mxu1 %v3790_v1  ;;  %v3802_v12 = vld [vmem:[%s4162_s29 + $0x20] sm:$0xff]   ;;  %v3803_v13 = vld [vmem:[%s4162_s29 + $0x28] sm:$0xff]   ;;  %v3804_v14 = vld [vmem:[%s4162_s29 + $0x30] sm:$0xff]  }
  0x13   : > { %3530 = vmatprep.subr.bf16.mxu1 %v3791_v2  ;;  %v3805_v15 = vld [vmem:[%s4162_s29 + $0x38] sm:$0xff]   ;;  %v3806_v16 = vld [vmem:[%s4162_s29 + $0x40] sm:$0xff]   ;;  %v3807_v17 = vld [vmem:[%s4162_s29 + $0x48] sm:$0xff]  }
  0x14   : > { %v3808_v18 = vld [vmem:[%s4162_s29 + $0x50] sm:$0xff]   ;;  %v3809_v19 = vld [vmem:[%s4162_s29 + $0x58] sm:$0xff]   ;;  %v3810_v20 = vld [vmem:[%s4162_s29 + $0x60] sm:$0xff]  }
  0x15   : > { %v3811_v21 = vld [vmem:[%s4162_s29 + $0x68] sm:$0xff]   ;;  %v3812_v22 = vld [vmem:[%s4162_s29 + $0x70] sm:$0xff]   ;;  %v3813_v23 = vld [vmem:[%s4162_s29 + $0x78] sm:$0xff]  }
  0x16   : > { %3531 = vmatpush3.bf16.msra.mxu1 %v3791_v2 }
  0x17   : > { %3540 = vmatprep.subr.bf16.mxu1 %v3794_v3 }
  0x19   : > { %3533 = vmatmul.mubr.msk.bf16.vlgmr.msra.gmra.mxu1 %vm366_vm0, %v3793_v4 }
  0x1a   : > { %3541 = vmatpush3.bf16.msra.mxu1 %v3794_v3  ;;  %3536 = vmatprep.mubr.msk.bf16.mxu1 %vm366_vm0, %v3795_v5 }
  0x1b   : > { %3542 = vmatprep.subr.bf16.mxu1 %v3797_v6 }
  0x1e   : > { %3543 = vmatpush3.bf16.msra.mxu1 %v3797_v6 }
  0x21   : > { %3537 = vmatmul.mubr.msk.bf16.gmra.mxu1 %vm366_vm0, %v3796_v7 }
  0x22   : > { %3544 = vmatprep.mubr.msk.bf16.mxu1 %vm366_vm0, %v3798_v8 }
  0x29   : > { %3545 = vmatmul.mubr.msk.bf16.vlgmr.msra.gmra.mxu1 %vm366_vm0, %v3799_v9 }
  0x2a   : > { %3548 = vmatprep.mubr.msk.bf16.mxu1 %vm366_vm0, %v3800_v10 }
  0x31   : > { %3549 = vmatmul.mubr.msk.bf16.gmra.mxu1 %vm366_vm0, %v3801_v11 }
  0x32   : > { %3552 = vmatprep.mubr.msk.bf16.mxu1 %vm366_vm0, %v3802_v12 }
  0x39   : > { %3553 = vmatmul.mubr.msk.bf16.gmra.mxu1 %vm366_vm0, %v3803_v13 }
  0x3a   : > { %3556 = vmatprep.mubr.msk.bf16.mxu1 %vm366_vm0, %v3804_v14 }
  0x41   : > { %3557 = vmatmul.mubr.msk.bf16.gmra.mxu1 %vm366_vm0, %v3805_v15 }
  0x42   : > { %3560 = vmatprep.mubr.msk.bf16.mxu1 %vm366_vm0, %v3806_v16 }
  0x49   : > { %3561 = vmatmul.mubr.msk.bf16.gmra.mxu1 %vm366_vm0, %v3807_v17 }
  0x4a   : > { %3564 = vmatprep.mubr.msk.bf16.mxu1 %vm366_vm0, %v3808_v18 }
  0x51   : > { %3565 = vmatmul.mubr.msk.bf16.gmra.mxu1 %vm366_vm0, %v3809_v19 }
  0x52   : > { %3568 = vmatprep.mubr.msk.bf16.mxu1 %vm366_vm0, %v3810_v20 }
  0x59   : > { %3569 = vmatmul.mubr.msk.bf16.gmra.mxu1 %vm366_vm0, %v3811_v21 }
  0x5a   : > { %3572 = vmatprep.mubr.msk.bf16.mxu1 %vm366_vm0, %v3812_v22  ;;  %v3816_v22 = vld [vmem:[%s5402_s4 + $0x20] sm:$0xff]  }
  0x61   : > { %3573 = vmatmul.mubr.msk.bf16.gmra.mxu1 %vm366_vm0, %v3813_v23  ;;  %v3814_v23 = vld [vmem:[%s269_s21 + $0x8] sm:$0xff]  }
  0xd9   : > { %v3534_v24 = vpop.f32.mrf.mxu1 }
  0xdb   : > { %v413_v25 = vpop.f32.mrf.mxu1 }
  0xdd   : > { %v3535_v26 = vpop.f32.mrf.mxu1 }
  0xde   : > { %v445_v27 = vpack.c.bf16 %v3535_v26, %v3534_v24  ;;  %v3815_v24 = vld [vmem:[%s269_s21] sm:$0xff]  }
  0xdf   : > { %v416_v28 = vpop.f32.mrf.mxu1 }
  0xe0   : > { %v444_v29 = vpack.c.bf16 %v416_v28, %v413_v25  ;;  %3576 = vmatprep.subr.bf16.mxu0 %v445_v27  ;;  %v3817_v25 = vld [vmem:[%s5402_s4 + $0x28] sm:$0xff]  }
  0xe1   : > { %v3538_v30 = vpop.f32.mrf.mxu1  ;;  %3577 = vmatpush3.bf16.msra.mxu0 %v445_v27 }
  0xe2   : > { %3578 = vmatprep.subr.bf16.mxu0 %v444_v29 }
  0xe3   : > { %v429_v31 = vpop.f32.mrf.mxu1 }
  0xe5   : > { %v3539_v32 = vpop.f32.mrf.mxu1  ;;  %3579 = vmatpush3.bf16.msra.mxu0 %v444_v29 }
  0xe6   : > { %v447_v33 = vpack.c.bf16 %v3539_v32, %v3538_v30  ;;  %3648 = vmatprep.subr.bf16.mxu0 %v3814_v23 }
  0xe7   : > { %v432_v34 = vpop.f32.mrf.mxu1 }
  0xe8   : > { %v1395_v35 = vsel %vm974_vm1, %v447_v33, 0  ;;  %v446_v36 = vpack.c.bf16 %v432_v34, %v429_v31  ;;  %3768 = vmatprep.subr.msk.bf16.mxu1 %vm974_vm1, %v447_v33 }
  0xe9   : > { %v4221_v37 = vpop.f32.mrf.mxu1  ;;  %3613 = vmatpush3.bf16.xpose.msra.mxu1 %v1395_v35 }
  0xea   : > { %3769 = vmatprep.subr.msk.bf16.mxu1 %vm974_vm1, %v446_v36  ;;  %v1392_v41 = vsel %vm974_vm1, %v446_v36, 0 }
  0xeb   : > { %v4224_v38 = vpop.f32.mrf.mxu1 }
  0xed   : > { %v4226_v39 = vpop.f32.mrf.mxu1 }
  0xee   : > { %v750_v43 = vpack.c.bf16 %v4226_v39, %v4221_v37 }
  0xef   : > { %v4228_v40 = vpop.f32.mrf.mxu1 }
  0xf0   : > { %v749_v42 = vpack.c.bf16 %v4228_v40, %v4224_v38 }
  0xf1   : > { %v4235_v44 = vpop.f32.mrf.mxu1  ;;  %3615 = vmatpush3.bf16.xpose.msra.mxu1 %v1392_v41 }
  0xf2   : > { %3580 = vmatprep.mubr.msk.bf16.mxu0 %vm366_vm0, %v749_v42 }
  0xf3   : > { %v4238_v45 = vpop.f32.mrf.mxu1  ;;  %3581 = vmatmul.mubr.msk.bf16.vlgmr.msra.gmra.mxu0 %vm366_vm0, %v750_v43 }
  0xf4   : > { %3649 = vmatpush3.bf16.msra.mxu0 %v3814_v23 }
  0xf5   : > { %v4241_v46 = vpop.f32.mrf.mxu1  ;;  %3650 = vmatprep.subr.bf16.mxu0 %v3815_v24 }
  0xf6   : > { %v752_v49 = vpack.c.bf16 %v4241_v46, %v4235_v44 }
  0xf7   : > { %v4243_v47 = vpop.f32.mrf.mxu1 }
  0xf8   : > { %v751_v48 = vpack.c.bf16 %v4243_v47, %v4238_v45  ;;  %3651 = vmatpush3.bf16.msra.mxu0 %v3815_v24 }
  0xf9   : > { %v4249_v50 = vpop.f32.mrf.mxu1 }
  0xfa   : > { %3584 = vmatprep.mubr.msk.bf16.mxu0 %vm366_vm0, %v751_v48 }
  0xfb   : > { %v4252_v51 = vpop.f32.mrf.mxu1  ;;  %3585 = vmatmul.mubr.msk.bf16.gmra.mxu0 %vm366_vm0, %v752_v49 }
  0xfd   : > { %v4255_v52 = vpop.f32.mrf.mxu1 }
  0xfe   : > { %v754_v55 = vpack.c.bf16 %v4255_v52, %v4249_v50 }
  0xff   : > { %v4257_v53 = vpop.f32.mrf.mxu1 }
 0x100   : > { %v753_v54 = vpack.c.bf16 %v4257_v53, %v4252_v51 }
 0x101   : > { %v4263_v56 = vpop.f32.mrf.mxu1 }
 0x102   : > { %3588 = vmatprep.mubr.msk.bf16.mxu0 %vm366_vm0, %v753_v54 }
 0x103   : > { %v4266_v57 = vpop.f32.mrf.mxu1  ;;  %3589 = vmatmul.mubr.msk.bf16.gmra.mxu0 %vm366_vm0, %v754_v55 }
 0x104   : > { %5438 = vst [vmem:[#allocation3_spill] sm:$0xff] %v4266_v57 }
 0x105   : > { %v4269_v58 = vpop.f32.mrf.mxu1 }
 0x106   : > { %5439 = vst [vmem:[#allocation4_spill] sm:$0xff] %v4269_v58  ;;  %v756_v61 = vpack.c.bf16 %v4269_v58, %v4263_v56 }
 0x107   : > { %v4271_v59 = vpop.f32.mrf.mxu1 }
 0x108   : > { %5440 = vst [vmem:[#allocation5_spill] sm:$0xff] %v4271_v59  ;;  %v755_v60 = vpack.c.bf16 %v4271_v59, %v4266_v57 }
 0x109   : > { %v4277_v62 = vpop.f32.mrf.mxu1 }
 0x10a   : > { %5441 = vst [vmem:[#allocation6_spill] sm:$0xff] %v4277_v62  ;;  %3592 = vmatprep.mubr.msk.bf16.mxu0 %vm366_vm0, %v755_v60 }
 0x10b   : > { %v4280_v63 = vpop.f32.mrf.mxu1  ;;  %3593 = vmatmul.mubr.msk.bf16.gmra.mxu0 %vm366_vm0, %v756_v61 }
 0x10c   : > { %5442 = vst [vmem:[#allocation7_spill] sm:$0xff] %v4280_v63 }
 0x10d   : > { %v4283_v0 = vpop.f32.mrf.mxu1 }
 0x10e   : > { %5443 = vst [vmem:[#allocation8_spill] sm:$0xff] %v4283_v0  ;;  %v758_v3 = vpack.c.bf16 %v4283_v0, %v4277_v62 }
 0x10f   : > { %v4285_v1 = vpop.f32.mrf.mxu1 }
 0x110   : > { %5444 = vst [vmem:[#allocation9_spill] sm:$0xff] %v4285_v1  ;;  %v757_v2 = vpack.c.bf16 %v4285_v1, %v4280_v63 }
 0x111   : > { %v4291_v4 = vpop.f32.mrf.mxu1 }
 0x112   : > { %5445 = vst [vmem:[#allocation10_spill] sm:$0xff] %v4291_v4  ;;  %3596 = vmatprep.mubr.msk.bf16.mxu0 %vm366_vm0, %v757_v2 }
 0x113   : > { %v4294_v5 = vpop.f32.mrf.mxu1  ;;  %3597 = vmatmul.mubr.msk.bf16.gmra.mxu0 %vm366_vm0, %v758_v3 }
 0x114   : > { %5446 = vst [vmem:[#allocation11_spill] sm:$0xff] %v4294_v5 }
 0x115   : > { %v4297_v6 = vpop.f32.mrf.mxu1 }
 0x116   : > { %5447 = vst [vmem:[#allocation12_spill] sm:$0xff] %v4297_v6  ;;  %v760_v9 = vpack.c.bf16 %v4297_v6, %v4291_v4 }
 0x117   : > { %v4299_v7 = vpop.f32.mrf.mxu1 }
 0x118   : > { %5448 = vst [vmem:[#allocation13_spill] sm:$0xff] %v4299_v7  ;;  %v759_v8 = vpack.c.bf16 %v4299_v7, %v4294_v5  ;;  %v3836_v7 = vld [vmem:[%s4188_s17 + $0x70] sm:$0xff]  }
 0x119   : > { %v4305_v10 = vpop.f32.mrf.mxu1 }
 0x11a   : > { %5449 = vst [vmem:[#allocation14_spill] sm:$0xff] %v4305_v10  ;;  %3600 = vmatprep.mubr.msk.bf16.mxu0 %vm366_vm0, %v759_v8 }
 0x11b   : > { %v4308_v11 = vpop.f32.mrf.mxu1  ;;  %3601 = vmatmul.mubr.msk.bf16.gmra.mxu0 %vm366_vm0, %v760_v9 }
 0x11c   : > { %5450 = vst [vmem:[#allocation15_spill] sm:$0xff] %v4308_v11 }
 0x11d   : > { %v4311_v12 = vpop.f32.mrf.mxu1 }
 0x11e   : > { %5451 = vst [vmem:[#allocation16_spill] sm:$0xff] %v4311_v12  ;;  %v762_v15 = vpack.c.bf16 %v4311_v12, %v4305_v10  ;;  %v3827_v12 = vld [vmem:[%s4188_s17 + $0x28] sm:$0xff]   ;;  %v3833_v10 = vld [vmem:[%s4188_s17 + $0x58] sm:$0xff]  }
 0x11f   : > { %v4313_v13 = vpop.f32.mrf.mxu1 }
 0x120   : > { %5452 = vst [vmem:[#allocation17_spill] sm:$0xff] %v4313_v13  ;;  %v761_v14 = vpack.c.bf16 %v4313_v13, %v4308_v11  ;;  %v3829_v11 = vld [vmem:[%s4188_s17 + $0x38] sm:$0xff]  }
 0x121   : > { %v4319_v16 = vpop.f32.mrf.mxu1 }
 0x122   : > { %5453 = vst [vmem:[#allocation18_spill] sm:$0xff] %v4319_v16  ;;  %3604 = vmatprep.mubr.msk.bf16.mxu0 %vm366_vm0, %v761_v14 }
 0x123   : > { %v4322_v17 = vpop.f32.mrf.mxu1  ;;  %3605 = vmatmul.mubr.msk.bf16.gmra.mxu0 %vm366_vm0, %v762_v15 }
 0x124   : > { %5454 = vst [vmem:[#allocation19_spill] sm:$0xff] %v4322_v17 }
 0x125   : > { %v4325_v18 = vpop.f32.mrf.mxu1 }
 0x126   : > { %5455 = vst [vmem:[#allocation20_spill] sm:$0xff] %v4325_v18  ;;  %v764_v21 = vpack.c.bf16 %v4325_v18, %v4319_v16 }
 0x127   : > { %v4327_v19 = vpop.f32.mrf.mxu1 }
 0x128   : > { %5456 = vst [vmem:[#allocation21_spill] sm:$0xff] %v4327_v19  ;;  %v763_v20 = vpack.c.bf16 %v4327_v19, %v4322_v17  ;;  %v3822_v19 = vld [vmem:[%s4188_s17] sm:$0xff]  }
 0x12a   : > { %3608 = vmatprep.mubr.msk.bf16.mxu0 %vm366_vm0, %v763_v20 }
 0x12b   : > { %3609 = vmatmul.mubr.msk.bf16.gmra.mxu0 %vm366_vm0, %v764_v21 }
 0x12c   : > { %3652 = vmatprep.mubr.msk.bf16.mxu0 %vm366_vm0, %v3816_v22 }
 0x133   : > { %3653 = vmatmul.mubr.msk.bf16.vlgmr.msra.gmra.mxu0 %vm366_vm0, %v3817_v25 }
 0x1b3   : > { %v4347_v26 = vpop.f32.mrf.mxu0 }
 0x1b4   : > { %v981_v27 = vsel %vm974_vm1, %v4347_v26, -inf }
 0x1b5   : > { %982 = vmax.xlane.f32.xlu1 %v981_v27  ;;  %v4351_v28 = vpop.f32.mrf.mxu0 }
 0x1b6   : > { %v975_v29 = vsel %vm974_vm1, %v4351_v28, -inf }
 0x1b7   : > { %976 = vmax.xlane.f32.xlu0 %v975_v29  ;;  %v4355_v30 = vpop.f32.mrf.mxu0 }
 0x1b8   : > { %v984_v31 = vsel %vm974_vm1, %v4355_v30, -inf }
 0x1b9   : > { %985 = vmax.xlane.f32.xlu1 %v984_v31  ;;  %v4359_v32 = vpop.f32.mrf.mxu0 }
 0x1ba   : > { %v978_v33 = vsel %vm974_vm1, %v4359_v32, -inf }
 0x1bb   : > { %979 = vmax.xlane.f32.xlu0 %v978_v33  ;;  %v4363_v34 = vpop.f32.mrf.mxu0 }
 0x1bc   : > { %v993_v43 = vsel %vm974_vm1, %v4363_v34, -inf }
 0x1bd   : > { %v4365_v35 = vpop.f32.mrf.mxu0 }
 0x1be   : > { %v987_v36 = vsel %vm974_vm1, %v4365_v35, -inf }
 0x1bf   : > { %988 = vmax.xlane.f32.xlu0 %v987_v36  ;;  %v4369_v41 = vpop.f32.mrf.mxu0  ;;  %v3818_v36 = vld [vmem:[%s5402_s4 + $0x30] sm:$0xff]  }
 0x1c0   : > { %v996_v55 = vsel %vm974_vm1, %v4369_v41, -inf  ;;  %3656 = vmatprep.mubr.msk.bf16.mxu0 %vm366_vm0, %v3818_v36 }
 0x1c1   : > { %v4371_v42 = vpop.f32.mrf.mxu0 }
 0x1c2   : > { %v990_v48 = vsel %vm974_vm1, %v4371_v42, -inf }
 0x1c3   : > { %994 = vmax.xlane.f32.xlu0 %v993_v43  ;;  %991 = vmax.xlane.f32.xlu1 %v990_v48  ;;  %v4377_v49 = vpop.f32.mrf.mxu0  ;;  %v3819_v48 = vld [vmem:[%s5402_s4 + $0x38] sm:$0xff]  }
 0x1c4   : > { %v1005_v3 = vsel %vm974_vm1, %v4377_v49, -inf  ;;  %3657 = vmatmul.mubr.msk.bf16.gmra.mxu0 %vm366_vm0, %v3819_v48 }
 0x1c5   : > { %v4379_v54 = vpop.f32.mrf.mxu0  ;;  %3664 = vmatprep.mubr.msk.bf16.mxu0 %vm366_vm0, %v3822_v19 }
 0x1c6   : > { %v999_v60 = vsel %vm974_vm1, %v4379_v54, -inf }
 0x1c7   : > { %997 = vmax.xlane.f32.xlu1 %v996_v55  ;;  %1000 = vmax.xlane.f32.xlu0 %v999_v60  ;;  %v4385_v61 = vpop.f32.mrf.mxu0 }
 0x1c8   : > { %v1008_v15 = vsel %vm974_vm1, %v4385_v61, -inf }
 0x1c9   : > { %v4387_v2 = vpop.f32.mrf.mxu0 }
 0x1ca   : > { %v1002_v8 = vsel %vm974_vm1, %v4387_v2, -inf }
 0x1cb   : > { %1006 = vmax.xlane.f32.xlu0 %v1005_v3  ;;  %1003 = vmax.xlane.f32.xlu1 %v1002_v8  ;;  %v4393_v9 = vpop.f32.mrf.mxu0 }
 0x1cc   : > { %v1017_v23 = vsel %vm974_vm1, %v4393_v9, -inf }
 0x1cd   : > { %v4395_v14 = vpop.f32.mrf.mxu0 }
 0x1ce   : > { %v1011_v20 = vsel %vm974_vm1, %v4395_v14, -inf }
 0x1cf   : > { %1009 = vmax.xlane.f32.xlu1 %v1008_v15  ;;  %1012 = vmax.xlane.f32.xlu0 %v1011_v20  ;;  %v4401_v21 = vpop.f32.mrf.mxu0 }
 0x1d0   : > { %v1020_v29 = vsel %vm974_vm1, %v4401_v21, -inf }
 0x1d1   : > { %v4403_v22 = vpop.f32.mrf.mxu0 }
 0x1d2   : > { %v1014_v24 = vsel %vm974_vm1, %v4403_v22, -inf }
 0x1d3   : > { %1018 = vmax.xlane.f32.xlu0 %v1017_v23  ;;  %1015 = vmax.xlane.f32.xlu1 %v1014_v24  ;;  %v4409_v25 = vpop.f32.mrf.mxu0  ;;  %v3820_v24 = vld [vmem:[%s5402_s4 + $0x58] sm:$0xff]  }
 0x1d4   : > { %v1029_v55 = vsel %vm974_vm1, %v4409_v25, -inf  ;;  %3660 = vmatprep.subr.bf16.mxu0 %v3820_v24 }
 0x1d5   : > { %v4411_v27 = vpop.f32.mrf.mxu0  ;;  %3661 = vmatpush3.bf16.msra.mxu0 %v3820_v24 }
 0x1d6   : > { %v1023_v31 = vsel %vm974_vm1, %v4411_v27, -inf }
 0x1d7   : > { %1021 = vmax.xlane.f32.xlu1 %v1020_v29  ;;  %1024 = vmax.xlane.f32.xlu0 %v1023_v31  ;;  %v4417_v33 = vpop.f32.mrf.mxu0 }
 0x1d8   : > { %v1032_v15 = vsel %vm974_vm1, %v4417_v33, -inf }
 0x1d9   : > { %v4422_v43 = vpop.f32.mrf.mxu0 }
 0x1da   : > { %v1026_v60 = vsel %vm974_vm1, %v4422_v43, -inf }
 0x1db   : > { %1030 = vmax.xlane.f32.xlu0 %v1029_v55  ;;  %1027 = vmax.xlane.f32.xlu1 %v1026_v60  ;;  %v4432_v3 = vpop.f32.mrf.mxu0  ;;  %v3821_v55 = vld [vmem:[%s5402_s4 + $0x50] sm:$0xff]  }
 0x1dc   : > { %v1041_v31 = vsel %vm974_vm1, %v4432_v3, -inf  ;;  %3662 = vmatprep.subr.bf16.mxu0 %v3821_v55 }
 0x1dd   : > { %v4435_v8 = vpop.f32.mrf.mxu0  ;;  %3663 = vmatpush3.bf16.msra.mxu0 %v3821_v55 }
 0x1de   : > { %v1035_v20 = vsel %vm974_vm1, %v4435_v8, -inf }
 0x1df   : > { %1033 = vmax.xlane.f32.xlu1 %v1032_v15  ;;  %1036 = vmax.xlane.f32.xlu0 %v1035_v20  ;;  %v4441_v23 = vpop.f32.mrf.mxu0 }
 0x1e0   : > { %v1044_v15 = vsel %vm974_vm1, %v4441_v23, -inf }
 0x1e1   : > { %v4446_v29 = vpop.f32.mrf.mxu0 }
 0x1e2   : > { %v1038_v36 = vsel %vm974_vm1, %v4446_v29, -inf }
 0x1e3   : > { %1042 = vmax.xlane.f32.xlu0 %v1041_v31  ;;  %1039 = vmax.xlane.f32.xlu1 %v1038_v36  ;;  %v4452_v48 = vpop.f32.mrf.mxu0  ;;  %v3823_v31 = vld [vmem:[%s4188_s17 + $0x8] sm:$0xff]  }
 0x1e4   : > { %3665 = vmatmul.mubr.msk.bf16.vlgmr.msra.gmra.mxu0 %vm366_vm0, %v3823_v31  ;;  %v1053_v18 = vsel %vm974_vm1, %v4452_v48, -inf  ;;  %v3824_v31 = vld [vmem:[%s4188_s17 + $0x10] sm:$0xff]  }
 0x1e5   : > { %v4457_v60 = vpop.f32.mrf.mxu0  ;;  %3668 = vmatprep.mubr.msk.bf16.mxu0 %vm366_vm0, %v3824_v31  ;;  %v3826_v31 = vld [vmem:[%s4188_s17 + $0x20] sm:$0xff]  }
 0x1e6   : > { %v1047_v20 = vsel %vm974_vm1, %v4457_v60, -inf }
 0x1e7   : > { %1045 = vmax.xlane.f32.xlu1 %v1044_v15  ;;  %1048 = vmax.xlane.f32.xlu0 %v1047_v20  ;;  %v4464_v24 = vpop.f32.mrf.mxu0 }
 0x1e8   : > { %v1056_v19 = vsel %vm974_vm1, %v4464_v24, -inf }
 0x1e9   : > { %v4468_v36 = vpop.f32.mrf.mxu0 }
 0x1ea   : > { %v1050_v55 = vsel %vm974_vm1, %v4468_v36, -inf }
 0x1eb   : > { %1054 = vmax.xlane.f32.xlu0 %v1053_v18  ;;  %1051 = vmax.xlane.f32.xlu1 %v1050_v55  ;;  %v4475_v15 = vpop.f32.mrf.mxu0  ;;  %v3825_v18 = vld [vmem:[%s4188_s17 + $0x18] sm:$0xff]  }
 0x1ec   : > { %3669 = vmatmul.mubr.msk.bf16.gmra.mxu0 %vm366_vm0, %v3825_v18  ;;  %v1065_v13 = vsel %vm974_vm1, %v4475_v15, -inf  ;;  %v3828_v18 = vld [vmem:[%s4188_s17 + $0x30] sm:$0xff]  }
 0x1ed   : > { %v4477_v20 = vpop.f32.mrf.mxu0  ;;  %3672 = vmatprep.mubr.msk.bf16.mxu0 %vm366_vm0, %v3826_v31  ;;  %v3835_v31 = vld [vmem:[%s4188_s17 + $0x68] sm:$0xff]  }
 0x1ee   : > { %v1059_v17 = vsel %vm974_vm1, %v4477_v20, -inf }
 0x1ef   : > { %1057 = vmax.xlane.f32.xlu1 %v1056_v19  ;;  %1060 = vmax.xlane.f32.xlu0 %v1059_v17  ;;  %v4484_v16 = vpop.f32.mrf.mxu0 }
 0x1f0   : > { %v1068_v17 = vsel %vm974_vm1, %v4484_v16, -inf }
 0x1f1   : > { %v4488_v55 = vpop.f32.mrf.mxu0 }
 0x1f2   : > { %v1062_v19 = vsel %vm974_vm1, %v4488_v55, -inf }
 0x1f3   : > { %1066 = vmax.xlane.f32.xlu0 %v1065_v13  ;;  %1063 = vmax.xlane.f32.xlu1 %v1062_v19  ;;  %v3830_v13 = vld [vmem:[%s4188_s17 + $0x40] sm:$0xff]   ;;  %v3831_v19 = vld [vmem:[%s4188_s17 + $0x48] sm:$0xff]  }
 0x1f4   : > { %3673 = vmatmul.mubr.msk.bf16.gmra.mxu0 %vm366_vm0, %v3827_v12  ;;  %v3834_v12 = vld [vmem:[%s4188_s17 + $0x60] sm:$0xff]  }
 0x1f5   : > { %3676 = vmatprep.mubr.msk.bf16.mxu0 %vm366_vm0, %v3828_v18 }
 0x1f7   : > { %1069 = vmax.xlane.f32.xlu1 %v1068_v17  ;;  %v3832_v17 = vld [vmem:[%s4188_s17 + $0x50] sm:$0xff]  }
 0x1fc   : > { %3677 = vmatmul.mubr.msk.bf16.gmra.mxu0 %vm366_vm0, %v3829_v11  ;;  %v3837_v11 = vld [vmem:[%s4188_s17 + $0x78] sm:$0xff]  }
 0x1fd   : > { %3680 = vmatprep.mubr.msk.bf16.mxu0 %vm366_vm0, %v3830_v13 }
 0x204   : > { %3681 = vmatmul.mubr.msk.bf16.gmra.mxu0 %vm366_vm0, %v3831_v19 }
 0x205   : > { %3684 = vmatprep.mubr.msk.bf16.mxu0 %vm366_vm0, %v3832_v17 }
 0x20c   : > { %3685 = vmatmul.mubr.msk.bf16.gmra.mxu0 %vm366_vm0, %v3833_v10 }
 0x20d   : > { %3688 = vmatprep.mubr.msk.bf16.mxu0 %vm366_vm0, %v3834_v12 }
 0x214   : > { %3689 = vmatmul.mubr.msk.bf16.gmra.mxu0 %vm366_vm0, %v3835_v31 }
 0x215   : > { %3692 = vmatprep.mubr.msk.bf16.mxu0 %vm366_vm0, %v3836_v7 }
 0x21c   : > { %3693 = vmatmul.mubr.msk.bf16.gmra.mxu0 %vm366_vm0, %v3837_v11 }
 0x23e   : > { %v983_v18 = vpop.xlane.xlu1 %982 }
 0x23f   : > { %v1073_v13 = vsub.f32 %v4347_v26, %v983_v18 }
 0x240   : > { %v977_v19 = vpop.xlane.xlu0 %976 }
 0x241   : > { %v1071_v17 = vsub.f32 %v4351_v28, %v977_v19  ;;  %v1107_v10 = vmul.f32 1.442695, %v1073_v13 }
 0x242   : > { %v986_v6 = vpop.xlane.xlu1 %985 }
 0x243   : > { %v1103_v5 = vmul.f32 1.442695, %v1071_v17  ;;  %v1074_v4 = vsub.f32 %v4355_v30, %v986_v6 }
 0x244   : > { %v980_v1 = vpop.xlane.xlu0 %979 }
 0x245   : > { %3838 = vpow2.f32 %v1103_v5  ;;  %v1072_v12 = vsub.f32 %v4359_v32, %v980_v1  ;;  %v1109_v7 = vmul.f32 1.442695, %v1074_v4 }
 0x246   : > { %3840 = vpow2.f32 %v1107_v10 }
 0x247   : > { %v1105_v31 = vmul.f32 1.442695, %v1072_v12 }
 0x248   : > { %v989_v0 = vpop.xlane.xlu0 %988 }
 0x249   : > { %3842 = vpow2.f32 %v1105_v31  ;;  %v1075_v11 = vsub.f32 %v4365_v35, %v989_v0 }
 0x24a   : > { %3844 = vpow2.f32 %v1109_v7 }
 0x24b   : > { %v1111_v26 = vmul.f32 1.442695, %v1075_v11 }
 0x24c   : > { %v995_v18 = vpop.xlane.xlu0 %994  ;;  %v992_v28 = vpop.xlane.xlu1 %991 }
 0x24d   : > { %3846 = vpow2.f32 %v1111_v26  ;;  %v1077_v13 = vsub.f32 %v4363_v34, %v995_v18  ;;  %v1076_v6 = vsub.f32 %v4371_v42, %v992_v28 }
 0x24f   : > { %v1115_v30 = vmul.f32 1.442695, %v1077_v13  ;;  %v1113_v5 = vmul.f32 1.442695, %v1076_v6 }
 0x250   : > { %v998_v19 = vpop.xlane.xlu1 %997  ;;  %v1001_v1 = vpop.xlane.xlu0 %1000 }
 0x251   : > { %3848 = vpow2.f32 %v1115_v30  ;;  %v1078_v4 = vsub.f32 %v4369_v41, %v998_v19  ;;  %v1079_v32 = vsub.f32 %v4379_v54, %v1001_v1 }
 0x252   : > { %v4530_v17 = vpop.eup %3838  ;;  %3850 = vpow2.f32 %v1113_v5 }
 0x253   : > { %v1117_v0 = vmul.f32 1.442695, %v1078_v4  ;;  %v1119_v35 = vmul.f32 1.442695, %v1079_v32  ;;  %v1167_v10 = vsel %vm974_vm1, %v4530_v17, 0.0  ;;  %v4534_v34 = vpop.eup %3840 }
 0x254   : > { %v1007_v42 = vpop.xlane.xlu0 %1006  ;;  %v1004_v12 = vpop.xlane.xlu1 %1003  ;;  %1168 = vadd.xlane.f32.xlu0 %v1167_v10  ;;  %v1173_v26 = vsel %vm974_vm1, %v4534_v34, 0.0 }
 0x255   : > { %3852 = vpow2.f32 %v1117_v0  ;;  %v1081_v7 = vsub.f32 %v4377_v49, %v1007_v42  ;;  %v1080_v41 = vsub.f32 %v4387_v2, %v1004_v12 }
 0x256   : > { %v4538_v31 = vpop.eup %3842  ;;  %3854 = vpow2.f32 %v1119_v35 }
 0x257   : > { %v1123_v54 = vmul.f32 1.442695, %v1081_v7  ;;  %v1121_v11 = vmul.f32 1.442695, %v1080_v41  ;;  %v1170_v18 = vsel %vm974_vm1, %v4538_v31, 0.0  ;;  %v4544_v28 = vpop.eup %3844 }
 0x258   : > { %v1010_v13 = vpop.xlane.xlu1 %1009  ;;  %v1013_v6 = vpop.xlane.xlu0 %1012  ;;  %1174 = vadd.xlane.f32.xlu0 %v1173_v26  ;;  %1171 = vadd.xlane.f32.xlu1 %v1170_v18  ;;  %v1176_v4 = vsel %vm974_vm1, %v4544_v28, 0.0 }
 0x259   : > { %3856 = vpow2.f32 %v1123_v54  ;;  %v1082_v49 = vsub.f32 %v4385_v61, %v1010_v13  ;;  %v1083_v2 = vsub.f32 %v4395_v14, %v1013_v6 }
 0x25a   : > { %v4548_v30 = vpop.eup %3846  ;;  %3858 = vpow2.f32 %v1121_v11 }
 0x25b   : > { %v1125_v5 = vmul.f32 1.442695, %v1082_v49  ;;  %v1127_v19 = vmul.f32 1.442695, %v1083_v2  ;;  %v1179_v1 = vsel %vm974_vm1, %v4548_v30, 0.0 }
 0x25c   : > { %v1019_v32 = vpop.xlane.xlu0 %1018  ;;  %v1016_v0 = vpop.xlane.xlu1 %1015  ;;  %1180 = vadd.xlane.f32.xlu0 %v1179_v1  ;;  %1177 = vadd.xlane.f32.xlu1 %v1176_v4 }
 0x25d   : > { %3860 = vpow2.f32 %v1125_v5  ;;  %v1085_v61 = vsub.f32 %v4393_v9, %v1019_v32  ;;  %v1084_v14 = vsub.f32 %v4403_v22, %v1016_v0 }
 0x25e   : > { %v4556_v35 = vpop.eup %3848  ;;  %3862 = vpow2.f32 %v1127_v19 }
 0x25f   : > { %v4558_v10 = vpop.eup %3850  ;;  %v1131_v42 = vmul.f32 1.442695, %v1085_v61  ;;  %v1129_v12 = vmul.f32 1.442695, %v1084_v14  ;;  %v1185_v7 = vsel %vm974_vm1, %v4556_v35, 0.0 }
 0x260   : > { %v1022_v41 = vpop.xlane.xlu1 %1021  ;;  %v1025_v54 = vpop.xlane.xlu0 %1024  ;;  %1186 = vadd.xlane.f32.xlu0 %v1185_v7  ;;  %v1182_v11 = vsel %vm974_vm1, %v4558_v10, 0.0 }
 0x261   : > { %3864 = vpow2.f32 %v1131_v42  ;;  %v1086_v9 = vsub.f32 %v4401_v21, %v1022_v41  ;;  %v1087_v22 = vsub.f32 %v4411_v27, %v1025_v54  ;;  %1183 = vadd.xlane.f32.xlu1 %v1182_v11 }
 0x262   : > { %v4566_v26 = vpop.eup %3852  ;;  %3866 = vpow2.f32 %v1129_v12 }
 0x263   : > { %v4568_v18 = vpop.eup %3854  ;;  %v1133_v13 = vmul.f32 1.442695, %v1086_v9  ;;  %v1135_v6 = vmul.f32 1.442695, %v1087_v22  ;;  %v1188_v49 = vsel %vm974_vm1, %v4566_v26, 0.0 }
 0x264   : > { %v1031_v2 = vpop.xlane.xlu0 %1030  ;;  %v1028_v5 = vpop.xlane.xlu1 %1027  ;;  %v1191_v19 = vsel %vm974_vm1, %v4568_v18, 0.0 }
 0x265   : > { %3868 = vpow2.f32 %v1133_v13  ;;  %v1089_v21 = vsub.f32 %v4409_v25, %v1031_v2  ;;  %v1088_v27 = vsub.f32 %v4422_v43, %v1028_v5  ;;  %1192 = vadd.xlane.f32.xlu0 %v1191_v19  ;;  %1189 = vadd.xlane.f32.xlu1 %v1188_v49 }
 0x266   : > { %v4576_v1 = vpop.eup %3856  ;;  %3870 = vpow2.f32 %v1135_v6 }
 0x267   : > { %v4578_v4 = vpop.eup %3858  ;;  %v1139_v32 = vmul.f32 1.442695, %v1089_v21  ;;  %v1137_v0 = vmul.f32 1.442695, %v1088_v27  ;;  %v1197_v61 = vsel %vm974_vm1, %v4576_v1, 0.0 }
 0x268   : > { %v1034_v14 = vpop.xlane.xlu1 %1033  ;;  %v1037_v42 = vpop.xlane.xlu0 %1036  ;;  %v1194_v12 = vsel %vm974_vm1, %v4578_v4, 0.0 }
 0x269   : > { %3872 = vpow2.f32 %v1139_v32  ;;  %v1090_v25 = vsub.f32 %v4417_v33, %v1034_v14  ;;  %v1091_v43 = vsub.f32 %v4435_v8, %v1037_v42  ;;  %1198 = vadd.xlane.f32.xlu0 %v1197_v61  ;;  %1195 = vadd.xlane.f32.xlu1 %v1194_v12 }
 0x26a   : > { %v4586_v7 = vpop.eup %3860  ;;  %3874 = vpow2.f32 %v1137_v0 }
 0x26b   : > { %v4588_v41 = vpop.eup %3862  ;;  %v1141_v54 = vmul.f32 1.442695, %v1090_v25  ;;  %v1143_v11 = vmul.f32 1.442695, %v1091_v43  ;;  %v1200_v9 = vsel %vm974_vm1, %v4586_v7, 0.0 }
 0x26c   : > { %v1043_v22 = vpop.xlane.xlu0 %1042  ;;  %v1040_v13 = vpop.xlane.xlu1 %1039  ;;  %v1203_v6 = vsel %vm974_vm1, %v4588_v41, 0.0 }
 0x26d   : > { %3876 = vpow2.f32 %v1141_v54  ;;  %v1093_v33 = vsub.f32 %v4432_v3, %v1043_v22  ;;  %v1092_v8 = vsub.f32 %v4446_v29, %v1040_v13  ;;  %1204 = vadd.xlane.f32.xlu0 %v1203_v6  ;;  %1201 = vadd.xlane.f32.xlu1 %v1200_v9 }
 0x26e   : > { %v4596_v49 = vpop.eup %3864  ;;  %3878 = vpow2.f32 %v1143_v11 }
 0x26f   : > { %v4598_v2 = vpop.eup %3866  ;;  %v1147_v5 = vmul.f32 1.442695, %v1093_v33  ;;  %v1145_v19 = vmul.f32 1.442695, %v1092_v8  ;;  %v1209_v21 = vsel %vm974_vm1, %v4596_v49, 0.0  ;;  %v3654_v8 = vpop.f32.mrf.mxu0 }
 0x270   : > { %v1046_v27 = vpop.xlane.xlu1 %1045  ;;  %v1049_v32 = vpop.xlane.xlu0 %1048  ;;  %v1206_v0 = vsel %vm974_vm1, %v4598_v2, 0.0 }
 0x271   : > { %3880 = vpow2.f32 %v1147_v5  ;;  %v1094_v3 = vsub.f32 %v4441_v23, %v1046_v27  ;;  %v1095_v29 = vsub.f32 %v4457_v60, %v1049_v32  ;;  %1210 = vadd.xlane.f32.xlu0 %v1209_v21  ;;  %1207 = vadd.xlane.f32.xlu1 %v1206_v0  ;;  %v1748_v27 = vpop.f32.mrf.mxu0 }
 0x272   : > { %v4606_v61 = vpop.eup %3868  ;;  %3882 = vpow2.f32 %v1145_v19 }
 0x273   : > { %v4608_v14 = vpop.eup %3870  ;;  %v1149_v42 = vmul.f32 1.442695, %v1094_v3  ;;  %v1151_v12 = vmul.f32 1.442695, %v1095_v29  ;;  %v1212_v25 = vsel %vm974_vm1, %v4606_v61, 0.0 }
 0x274   : > { %v1055_v43 = vpop.xlane.xlu0 %1054  ;;  %v1052_v54 = vpop.xlane.xlu1 %1051  ;;  %v1215_v11 = vsel %vm974_vm1, %v4608_v14, 0.0 }
 0x275   : > { %3884 = vpow2.f32 %v1149_v42  ;;  %v1097_v23 = vsub.f32 %v4452_v48, %v1055_v43  ;;  %v1096_v60 = vsub.f32 %v4468_v36, %v1052_v54  ;;  %1216 = vadd.xlane.f32.xlu0 %v1215_v11  ;;  %1213 = vadd.xlane.f32.xlu1 %v1212_v25 }
 0x276   : > { %v4616_v9 = vpop.eup %3872  ;;  %3886 = vpow2.f32 %v1151_v12  ;;  %v3655_v12 = vpop.f32.mrf.mxu0 }
 0x277   : > { %v4618_v22 = vpop.eup %3874  ;;  %v1155_v13 = vmul.f32 1.442695, %v1097_v23  ;;  %v1153_v6 = vmul.f32 1.442695, %v1096_v60  ;;  %v1221_v33 = vsel %vm974_vm1, %v4616_v9, 0.0  ;;  %v4634_v54 = vpack.c.bf16 %v3655_v12, %v3654_v8 }
 0x278   : > { %v1058_v5 = vpop.xlane.xlu1 %1057  ;;  %v1061_v19 = vpop.xlane.xlu0 %1060  ;;  %v1218_v48 = vsel %vm974_vm1, %v4618_v22, 0.0 }
 0x279   : > { %3888 = vpow2.f32 %v1155_v13  ;;  %v1098_v36 = vsub.f32 %v4464_v24, %v1058_v5  ;;  %1222 = vadd.xlane.f32.xlu0 %v1221_v33  ;;  %v1099_v21 = vsub.f32 %v4477_v20, %v1061_v19  ;;  %1219 = vadd.xlane.f32.xlu1 %v1218_v48  ;;  %v1751_v23 = vpop.f32.mrf.mxu0 }
 0x27a   : > { %v4626_v32 = vpop.eup %3876  ;;  %3890 = vpow2.f32 %v1153_v6  ;;  %v4640_v13 = vpack.c.bf16 %v1751_v23, %v1748_v27  ;;  %3696 = vmatprep.subr.bf16.mxu1 %v4634_v54 }
 0x27b   : > { %v4628_v0 = vpop.eup %3878  ;;  %v1157_v3 = vmul.f32 1.442695, %v1098_v36  ;;  %v1159_v29 = vmul.f32 1.442695, %v1099_v21  ;;  %v1224_v42 = vsel %vm974_vm1, %v4626_v32, 0.0 }
 0x27c   : > { %v1227_v25 = vsel %vm974_vm1, %v4628_v0, 0.0  ;;  %v1067_v24 = vpop.xlane.xlu0 %1066  ;;  %v1064_v43 = vpop.xlane.xlu1 %1063 }
 0x27d   : > { %3892 = vpow2.f32 %v1157_v3  ;;  %1228 = vadd.xlane.f32.xlu0 %v1227_v25  ;;  %v1101_v20 = vsub.f32 %v4475_v15, %v1067_v24  ;;  %1225 = vadd.xlane.f32.xlu1 %v1224_v42  ;;  %v1100_v11 = vsub.f32 %v4488_v55, %v1064_v43 }
 0x27e   : > { %v4638_v60 = vpop.eup %3880  ;;  %3894 = vpow2.f32 %v1159_v29 }
 0x27f   : > { %v4643_v6 = vpop.eup %3882  ;;  %v1163_v33 = vmul.f32 1.442695, %v1101_v20  ;;  %v1161_v8 = vmul.f32 1.442695, %v1100_v11  ;;  %v1233_v5 = vsel %vm974_vm1, %v4638_v60, 0.0 }
 0x280   : > { %v1230_v15 = vsel %vm974_vm1, %v4643_v6, 0.0  ;;  %v1070_v19 = vpop.xlane.xlu1 %1069 }
 0x281   : > { %3896 = vpow2.f32 %v1163_v33  ;;  %1234 = vadd.xlane.f32.xlu0 %v1233_v5  ;;  %1231 = vadd.xlane.f32.xlu1 %v1230_v15  ;;  %v1102_v55 = vsub.f32 %v4484_v16, %v1070_v19 }
 0x282   : > { %v4650_v48 = vpop.eup %3884  ;;  %3898 = vpow2.f32 %v1161_v8 }
 0x283   : > { %v4652_v36 = vpop.eup %3886  ;;  %v1165_v21 = vmul.f32 1.442695, %v1102_v55  ;;  %v1236_v27 = vsel %vm974_vm1, %v4650_v48, 0.0 }
 0x284   : > { %v1239_v3 = vsel %vm974_vm1, %v4652_v36, 0.0  ;;  %v3658_v19 = vpop.f32.mrf.mxu0 }
 0x285   : > { %3900 = vpow2.f32 %v1165_v21  ;;  %1240 = vadd.xlane.f32.xlu0 %v1239_v3  ;;  %1237 = vadd.xlane.f32.xlu1 %v1236_v27 }
 0x286   : > { %v4658_v29 = vpop.eup %3888  ;;  %v1764_v55 = vpop.f32.mrf.mxu0 }
 0x287   : > { %v4660_v42 = vpop.eup %3890  ;;  %v1245_v16 = vsel %vm974_vm1, %v4658_v29, 0.0 }
 0x288   : > { %v1242_v12 = vsel %vm974_vm1, %v4660_v42, 0.0  ;;  %v3659_v21 = vpop.f32.mrf.mxu0 }
 0x289   : > { %1246 = vadd.xlane.f32.xlu0 %v1245_v16  ;;  %1243 = vadd.xlane.f32.xlu1 %v1242_v12  ;;  %v1782_v27 = vpack.c.bf16 %v3659_v21, %v3658_v19 }
 0x28a   : > { %v4666_v25 = vpop.eup %3892  ;;  %v1767_v16 = vpop.f32.mrf.mxu0 }
 0x28b   : > { %v4668_v24 = vpop.eup %3894  ;;  %v1248_v43 = vsel %vm974_vm1, %v4666_v25, 0.0  ;;  %v2729_v3 = vsel %vm974_vm1, %v1782_v27, 0  ;;  %3770 = vmatprep.subr.msk.bf16.mxu0 %vm974_vm1, %v1782_v27  ;;  %v1781_v12 = vpack.c.bf16 %v1767_v16, %v1764_v55 }
 0x28c   : > { %v1251_v20 = vsel %vm974_vm1, %v4668_v24, 0.0  ;;  %3733 = vmatpush3.bf16.xpose.msra.mxu0 %v2729_v3 }
 0x28d   : > { %1252 = vadd.xlane.f32.xlu0 %v1251_v20  ;;  %1249 = vadd.xlane.f32.xlu1 %v1248_v43  ;;  %v2726_v43 = vsel %vm974_vm1, %v1781_v12, 0 }
 0x28e   : > { %v4674_v11 = vpop.eup %3896  ;;  %3771 = vmatprep.subr.msk.bf16.mxu0 %vm974_vm1, %v1781_v12 }
 0x28f   : > { %v4676_v23 = vpop.eup %3898  ;;  %v1257_v33 = vsel %vm974_vm1, %v4674_v11, 0.0 }
 0x290   : > { %v1254_v8 = vsel %vm974_vm1, %v4676_v23, 0.0 }
 0x291   : > { %1258 = vadd.xlane.f32.xlu0 %v1257_v33  ;;  %1255 = vadd.xlane.f32.xlu1 %v1254_v8 }
 0x292   : > { %v4682_v5 = vpop.eup %3900 }
 0x293   : > { %v1260_v15 = vsel %vm974_vm1, %v4682_v5, 0.0 }
 0x294   : > { %3735 = vmatpush3.bf16.xpose.msra.mxu0 %v2726_v43 }
 0x295   : > { %1261 = vadd.xlane.f32.xlu1 %v1260_v15 }
 0x2a4   : > { %v4690_v21 = vpop.f32.mrf.mxu0 }
 0x2a6   : > { %v4692_v55 = vpop.f32.mrf.mxu0 }
 0x2a8   : > { %v4694_v63 = vpop.f32.mrf.mxu0 }
 0x2aa   : > { %v4698_v58 = vpop.f32.mrf.mxu0 }
 0x2dd   : > { %v1169_v20 = vpop.xlane.xlu0 %1168 }
 0x2de   : > { %3902 = vrcp.f32 %v1169_v20 }
 0x2e1   : > { %v1175_v33 = vpop.xlane.xlu0 %1174  ;;  %v1172_v8 = vpop.xlane.xlu1 %1171 }
 0x2e2   : > { %3904 = vrcp.f32 %v1172_v8 }
 0x2e3   : > { %3906 = vrcp.f32 %v1175_v33 }
 0x2e5   : > { %v1181_v15 = vpop.xlane.xlu0 %1180  ;;  %v1178_v19 = vpop.xlane.xlu1 %1177 }
 0x2e6   : > { %3908 = vrcp.f32 %v1178_v19 }
 0x2e7   : > { %3910 = vrcp.f32 %v1181_v15 }
 0x2e9   : > { %v1187_v27 = vpop.xlane.xlu0 %1186 }
 0x2ea   : > { %v1184_v3 = vpop.xlane.xlu1 %1183 }
 0x2eb   : > { %3912 = vrcp.f32 %v1184_v3  ;;  %v3903_v16 = vpop.eup %3902 }
 0x2ec   : > { %3914 = vrcp.f32 %v1187_v27  ;;  %v1295_v33 = vmul.f32 %v3903_v16, %v4530_v17 }
 0x2ee   : > { %v1193_v12 = vpop.xlane.xlu0 %1192  ;;  %v1190_v43 = vpop.xlane.xlu1 %1189 }
 0x2ef   : > { %v3905_v20 = vpop.eup %3904  ;;  %3916 = vrcp.f32 %v1190_v43 }
 0x2f0   : > { %v1296_v8 = vmul.f32 %v3905_v20, %v4538_v31  ;;  %v3907_v19 = vpop.eup %3906  ;;  %3918 = vrcp.f32 %v1193_v12  ;;  %v4703_v12 = vpop.f32.mrf.mxu0 }
 0x2f1   : > { %v1297_v27 = vmul.f32 %v3907_v19, %v4534_v34 }
 0x2f2   : > { %v1199_v15 = vpop.xlane.xlu0 %1198  ;;  %v1196_v62 = vpop.xlane.xlu1 %1195  ;;  %v1327_v59 = vpack.c.bf16 %v1296_v8, %v1295_v33 }
 0x2f3   : > { %v3909_v3 = vpop.eup %3908  ;;  %3920 = vrcp.f32 %v1196_v62 }
 0x2f4   : > { %v1298_v57 = vmul.f32 %v3909_v3, %v4544_v28  ;;  %3616 = vmatprep.mubr.msk.bf16.mxu1 %vm974_vm1, %v1327_v59  ;;  %v3911_v43 = vpop.eup %3910  ;;  %3922 = vrcp.f32 %v1199_v15 }
 0x2f5   : > { %v1299_v62 = vmul.f32 %v3911_v43, %v4548_v30 }
 0x2f6   : > { %v1205_v17 = vpop.xlane.xlu0 %1204  ;;  %v1202_v16 = vpop.xlane.xlu1 %1201  ;;  %v1328_v31 = vpack.c.bf16 %v1298_v57, %v1297_v27 }
 0x2f7   : > { %3924 = vrcp.f32 %v1202_v16  ;;  %v4710_v57 = vpop.f32.mrf.mxu0 }
 0x2f8   : > { %v3913_v20 = vpop.eup %3912  ;;  %3617 = vmatmul.mubr.msk.bf16.vlgmr.msra.gmra.mxu1 %vm974_vm1, %v1328_v31  ;;  %3926 = vrcp.f32 %v1205_v17 }
 0x2f9   : > { %v1300_v33 = vmul.f32 %v3913_v20, %v4558_v10  ;;  %3697 = vmatpush3.bf16.msra.mxu1 %v4634_v54  ;;  %v3915_v28 = vpop.eup %3914  ;;  %v4716_v43 = vpop.f32.mrf.mxu0 }
 0x2fa   : > { %v1211_v34 = vpop.xlane.xlu0 %1210  ;;  %v1208_v59 = vpop.xlane.xlu1 %1207  ;;  %3698 = vmatprep.subr.bf16.mxu1 %v4640_v13  ;;  %v1301_v15 = vmul.f32 %v3915_v28, %v4556_v35 }
 0x2fb   : > { %v1329_v8 = vpack.c.bf16 %v1300_v33, %v1299_v62  ;;  %3928 = vrcp.f32 %v1208_v59  ;;  %v4721_v33 = vpop.f32.mrf.mxu0 }
 0x2fc   : > { %v3917_v19 = vpop.eup %3916  ;;  %3930 = vrcp.f32 %v1211_v34 }
 0x2fd   : > { %3620 = vmatprep.mubr.msk.bf16.mxu1 %vm974_vm1, %v1329_v8  ;;  %3699 = vmatpush3.bf16.msra.mxu1 %v4640_v13  ;;  %v1302_v54 = vmul.f32 %v3917_v19, %v4566_v26  ;;  %v3919_v3 = vpop.eup %3918 }
 0x2fe   : > { %v1217_v30 = vpop.xlane.xlu0 %1216  ;;  %v1214_v10 = vpop.xlane.xlu1 %1213  ;;  %v1303_v20 = vmul.f32 %v3919_v3, %v4568_v18 }
 0x2ff   : > { %3932 = vrcp.f32 %v1214_v10  ;;  %v1330_v27 = vpack.c.bf16 %v1302_v54, %v1301_v15 }
 0x300   : > { %v3921_v17 = vpop.eup %3920  ;;  %3934 = vrcp.f32 %v1217_v30  ;;  %v4726_v30 = vpop.f32.mrf.mxu0 }
 0x301   : > { %3621 = vmatmul.mubr.msk.bf16.gmra.mxu1 %vm974_vm1, %v1330_v27  ;;  %v1304_v13 = vmul.f32 %v3921_v17, %v4578_v4  ;;  %v3923_v62 = vpop.eup %3922  ;;  %5457 = vst [vmem:[#allocation22_spill] sm:$0xff] %v4726_v30 }
 0x302   : > { %v1223_v16 = vpop.xlane.xlu0 %1222  ;;  %v1220_v31 = vpop.xlane.xlu1 %1219  ;;  %v1305_v28 = vmul.f32 %v3923_v62, %v4576_v1 }
 0x303   : > { %3936 = vrcp.f32 %v1220_v31  ;;  %v1331_v35 = vpack.c.bf16 %v1304_v13, %v1303_v20  ;;  %v4731_v17 = vpop.f32.mrf.mxu0 }
 0x304   : > { %v3925_v26 = vpop.eup %3924  ;;  %3938 = vrcp.f32 %v1223_v16  ;;  %5458 = vst [vmem:[#allocation23_spill] sm:$0xff] %v4731_v17 }
 0x305   : > { %3624 = vmatprep.mubr.msk.bf16.mxu1 %vm974_vm1, %v1331_v35  ;;  %v1306_v8 = vmul.f32 %v3925_v26, %v4586_v7  ;;  %v3927_v19 = vpop.eup %3926  ;;  %v4736_v35 = vpop.f32.mrf.mxu0 }
 0x306   : > { %v1229_v34 = vpop.xlane.xlu0 %1228  ;;  %v1226_v59 = vpop.xlane.xlu1 %1225  ;;  %v1307_v54 = vmul.f32 %v3927_v19, %v4588_v41  ;;  %5459 = vst [vmem:[#allocation24_spill] sm:$0xff] %v4736_v35 }
 0x307   : > { %3940 = vrcp.f32 %v1226_v59  ;;  %v1332_v18 = vpack.c.bf16 %v1306_v8, %v1305_v28  ;;  %v4741_v19 = vpop.f32.mrf.mxu0 }
 0x308   : > { %v3929_v4 = vpop.eup %3928  ;;  %3942 = vrcp.f32 %v1229_v34  ;;  %5460 = vst [vmem:[#allocation25_spill] sm:$0xff] %v4741_v19 }
 0x309   : > { %3625 = vmatmul.mubr.msk.bf16.gmra.mxu1 %vm974_vm1, %v1332_v18  ;;  %v1308_v3 = vmul.f32 %v3929_v4, %v4598_v2  ;;  %v3931_v27 = vpop.eup %3930 }
 0x30a   : > { %v1235_v10 = vpop.xlane.xlu0 %1234  ;;  %v1232_v15 = vpop.xlane.xlu1 %1231  ;;  %v1309_v20 = vmul.f32 %v3931_v27, %v4596_v49 }
 0x30b   : > { %3944 = vrcp.f32 %v1232_v15  ;;  %v1333_v1 = vpack.c.bf16 %v1308_v3, %v1307_v54  ;;  %v4746_v3 = vpop.f32.mrf.mxu0 }
 0x30c   : > { %v3933_v7 = vpop.eup %3932  ;;  %3946 = vrcp.f32 %v1235_v10 }
 0x30d   : > { %3628 = vmatprep.mubr.msk.bf16.mxu1 %vm974_vm1, %v1333_v1  ;;  %v1310_v13 = vmul.f32 %v3933_v7, %v4606_v61  ;;  %v3935_v62 = vpop.eup %3934 }
 0x30e   : > { %v1241_v16 = vpop.xlane.xlu0 %1240  ;;  %v1238_v31 = vpop.xlane.xlu1 %1237  ;;  %v1311_v59 = vmul.f32 %v3935_v62, %v4608_v14 }
 0x30f   : > { %3948 = vrcp.f32 %v1238_v31  ;;  %v1334_v41 = vpack.c.bf16 %v1310_v13, %v1309_v20  ;;  %v4751_v20 = vpop.f32.mrf.mxu0 }
 0x310   : > { %v3937_v2 = vpop.eup %3936  ;;  %3950 = vrcp.f32 %v1241_v16  ;;  %5461 = vst [vmem:[#allocation26_spill] sm:$0xff] %v4751_v20 }
 0x311   : > { %3629 = vmatmul.mubr.msk.bf16.gmra.mxu1 %vm974_vm1, %v1334_v41  ;;  %v1312_v28 = vmul.f32 %v3937_v2, %v4618_v22  ;;  %v3939_v8 = vpop.eup %3938 }
 0x312   : > { %v1247_v26 = vpop.xlane.xlu0 %1246  ;;  %v1244_v34 = vpop.xlane.xlu1 %1243  ;;  %v1313_v10 = vmul.f32 %v3939_v8, %v4616_v9 }
 0x313   : > { %3952 = vrcp.f32 %v1244_v34  ;;  %v1335_v49 = vpack.c.bf16 %v1312_v28, %v1311_v59 }
 0x314   : > { %v3941_v61 = vpop.eup %3940  ;;  %3954 = vrcp.f32 %v1247_v26 }
 0x315   : > { %3632 = vmatprep.mubr.msk.bf16.mxu1 %vm974_vm1, %v1335_v49  ;;  %v1314_v15 = vmul.f32 %v3941_v61, %v4626_v32  ;;  %v3943_v54 = vpop.eup %3942 }
 0x316   : > { %v1253_v18 = vpop.xlane.xlu0 %1252  ;;  %v1250_v4 = vpop.xlane.xlu1 %1249  ;;  %v1315_v7 = vmul.f32 %v3943_v54, %v4628_v0 }
 0x317   : > { %3956 = vrcp.f32 %v1250_v4  ;;  %v1336_v14 = vpack.c.bf16 %v1314_v15, %v1313_v10  ;;  %v4756_v0 = vpop.f32.mrf.mxu0 }
 0x318   : > { %v3945_v22 = vpop.eup %3944  ;;  %3958 = vrcp.f32 %v1253_v18 }
 0x319   : > { %3633 = vmatmul.mubr.msk.bf16.gmra.mxu1 %vm974_vm1, %v1336_v14  ;;  %v1316_v16 = vmul.f32 %v3945_v22, %v4643_v6  ;;  %v3947_v31 = vpop.eup %3946  ;;  %v4761_v49 = vpop.f32.mrf.mxu0 }
 0x31a   : > { %v1259_v27 = vpop.xlane.xlu0 %1258  ;;  %v1256_v1 = vpop.xlane.xlu1 %1255  ;;  %v1317_v62 = vmul.f32 %v3947_v31, %v4638_v60  ;;  %5462 = vst [vmem:[#allocation27_spill] sm:$0xff] %v4761_v49 }
 0x31b   : > { %3960 = vrcp.f32 %v1256_v1  ;;  %v1337_v9 = vpack.c.bf16 %v1316_v16, %v1315_v7  ;;  %v4766_v10 = vpop.f32.mrf.mxu0  ;;  %v2084_v1 = vpack.c.bf16 %v4698_v58, %v4692_v55 }
 0x31c   : > { %v3949_v32 = vpop.eup %3948  ;;  %3962 = vrcp.f32 %v1259_v27 }
 0x31d   : > { %3636 = vmatprep.mubr.msk.bf16.mxu1 %vm974_vm1, %v1337_v9  ;;  %v1318_v41 = vmul.f32 %v3949_v32, %v4650_v48  ;;  %v3951_v2 = vpop.eup %3950  ;;  %v4771_v27 = vpop.f32.mrf.mxu0  ;;  %v2088_v9 = vpack.c.bf16 %v4741_v19, %v4731_v17  ;;  %v2087_v32 = vpack.c.bf16 %v4716_v43, %v4703_v12 }
 0x31e   : > { %v1262_v13 = vpop.xlane.xlu1 %1261  ;;  %v1319_v34 = vmul.f32 %v3951_v2, %v4652_v36  ;;  %v2089_v2 = vpack.c.bf16 %v4736_v35, %v4726_v30 }
 0x31f   : > { %3964 = vrcp.f32 %v1262_v13  ;;  %v1338_v26 = vpack.c.bf16 %v1318_v41, %v1317_v62  ;;  %v4778_v16 = vpop.f32.mrf.mxu0  ;;  %v2090_v41 = vpack.c.bf16 %v4761_v49, %v4751_v20 }
 0x320   : > { %v3953_v6 = vpop.eup %3952 }
 0x321   : > { %3637 = vmatmul.mubr.msk.bf16.gmra.mxu1 %vm974_vm1, %v1338_v26  ;;  %v1320_v59 = vmul.f32 %v3953_v6, %v4660_v42  ;;  %v3955_v28 = vpop.eup %3954 }
 0x322   : > { %v1321_v60 = vmul.f32 %v3955_v28, %v4658_v29 }
 0x323   : > { %v1339_v8 = vpack.c.bf16 %v1320_v59, %v1319_v34  ;;  %v2091_v59 = vpack.c.bf16 %v4756_v0, %v4746_v3 }
 0x324   : > { %v3957_v61 = vpop.eup %3956 }
 0x325   : > { %3640 = vmatprep.mubr.msk.bf16.mxu1 %vm974_vm1, %v1339_v8  ;;  %v1322_v48 = vmul.f32 %v3957_v61, %v4666_v25  ;;  %v3959_v18 = vpop.eup %3958 }
 0x326   : > { %v1323_v36 = vmul.f32 %v3959_v18, %v4668_v24  ;;  %v4782_v24 = vpop.f32.mrf.mxu0 }
 0x327   : > { %v1340_v4 = vpack.c.bf16 %v1322_v48, %v1321_v60  ;;  %v2092_v34 = vpack.c.bf16 %v4782_v24, %v4771_v27  ;;  %v2093_v60 = vpack.c.bf16 %v4778_v16, %v4766_v10 }
 0x328   : > { %v3961_v15 = vpop.eup %3960 }
 0x329   : > { %v3963_v54 = vpop.eup %3962  ;;  %3641 = vmatmul.mubr.msk.bf16.gmra.mxu1 %vm974_vm1, %v1340_v4  ;;  %v1324_v42 = vmul.f32 %v3961_v15, %v4676_v23  ;;  %v2086_v23 = vpack.c.bf16 %v4721_v33, %v4710_v57 }
 0x32a   : > { %v1325_v29 = vmul.f32 %v3963_v54, %v4674_v11  ;;  %v2085_v11 = vpack.c.bf16 %v4694_v63, %v4690_v21 }
 0x32b   : > { %v1341_v22 = vpack.c.bf16 %v1324_v42, %v1323_v36 }
 0x32c   : > { %v3965_v14 = vpop.eup %3964 }
 0x32d   : > { %v1326_v25 = vmul.f32 %v3965_v14, %v4682_v5  ;;  %3644 = vmatprep.mubr.msk.bf16.mxu1 %vm974_vm1, %v1341_v22  ;;  %v4788_v5 = vpop.f32.mrf.mxu0 }
 0x32e   : > { %5463 = vst [vmem:[#allocation28_spill] sm:$0xff] %v4788_v5 }
 0x32f   : > { %v1342_v7 = vpack.c.bf16 %v1326_v25, %v1325_v29  ;;  %v4792_v31 = vpop.f32.mrf.mxu0 }
 0x330   : > { %5464 = vst [vmem:[#allocation29_spill] sm:$0xff] %v4792_v31 }
 0x331   : > { %3645 = vmatmul.mubr.msk.bf16.gmra.mxu1 %vm974_vm1, %v1342_v7  ;;  %v4798_v13 = vpop.f32.mrf.mxu0 }
 0x332   : > { %3700 = vmatprep.mubr.msk.bf16.mxu1 %vm366_vm0, %v2084_v1  ;;  %5465 = vst [vmem:[#allocation30_spill] sm:$0xff] %v4798_v13  ;;  %v2095_v15 = vpack.c.bf16 %v4798_v13, %v4788_v5 }
 0x333   : > { %v4802_v62 = vpop.f32.mrf.mxu0 }
 0x334   : > { %5466 = vst [vmem:[#allocation31_spill] sm:$0xff] %v4802_v62  ;;  %v2094_v61 = vpack.c.bf16 %v4802_v62, %v4792_v31 }
 0x335   : > { %v4808_v26 = vpop.f32.mrf.mxu0 }
 0x336   : > { %5467 = vst [vmem:[#allocation32_spill] sm:$0xff] %v4808_v26 }
 0x337   : > { %v4812_v6 = vpop.f32.mrf.mxu0 }
 0x338   : > { %5468 = vst [vmem:[#allocation33_spill] sm:$0xff] %v4812_v6 }
 0x339   : > { %3701 = vmatmul.mubr.msk.bf16.vlgmr.msra.gmra.mxu1 %vm366_vm0, %v2085_v11  ;;  %v4818_v28 = vpop.f32.mrf.mxu0 }
 0x33a   : > { %3704 = vmatprep.mubr.msk.bf16.mxu1 %vm366_vm0, %v2086_v23  ;;  %5469 = vst [vmem:[#allocation34_spill] sm:$0xff] %v4818_v28  ;;  %v2097_v14 = vpack.c.bf16 %v4818_v28, %v4808_v26 }
 0x33b   : > { %v4822_v8 = vpop.f32.mrf.mxu0 }
 0x33c   : > { %5470 = vst [vmem:[#allocation35_spill] sm:$0xff] %v4822_v8  ;;  %v2096_v4 = vpack.c.bf16 %v4822_v8, %v4812_v6 }
 0x33d   : > { %v4828_v48 = vpop.f32.mrf.mxu0 }
 0x33f   : > { %v4832_v18 = vpop.f32.mrf.mxu0 }
 0x341   : > { %3705 = vmatmul.mubr.msk.bf16.gmra.mxu1 %vm366_vm0, %v2087_v32  ;;  %v4838_v54 = vpop.f32.mrf.mxu0 }
 0x342   : > { %3708 = vmatprep.mubr.msk.bf16.mxu1 %vm366_vm0, %v2088_v9  ;;  %v2099_v22 = vpack.c.bf16 %v4838_v54, %v4828_v48 }
 0x343   : > { %v4842_v36 = vpop.f32.mrf.mxu0 }
 0x344   : > { %5471 = vst [vmem:[#allocation36_spill] sm:$0xff] %v4842_v36  ;;  %v2098_v42 = vpack.c.bf16 %v4842_v36, %v4832_v18 }
 0x349   : > { %3709 = vmatmul.mubr.msk.bf16.gmra.mxu1 %vm366_vm0, %v2089_v2 }
 0x34a   : > { %3712 = vmatprep.mubr.msk.bf16.mxu1 %vm366_vm0, %v2090_v41 }
 0x351   : > { %3713 = vmatmul.mubr.msk.bf16.gmra.mxu1 %vm366_vm0, %v2091_v59 }
 0x352   : > { %3716 = vmatprep.mubr.msk.bf16.mxu1 %vm366_vm0, %v2092_v34 }
 0x359   : > { %3717 = vmatmul.mubr.msk.bf16.gmra.mxu1 %vm366_vm0, %v2093_v60 }
 0x35a   : > { %3720 = vmatprep.mubr.msk.bf16.mxu1 %vm366_vm0, %v2094_v61 }
 0x361   : > { %3721 = vmatmul.mubr.msk.bf16.gmra.mxu1 %vm366_vm0, %v2095_v15 }
 0x362   : > { %3724 = vmatprep.mubr.msk.bf16.mxu1 %vm366_vm0, %v2096_v4 }
 0x369   : > { %3725 = vmatmul.mubr.msk.bf16.gmra.mxu1 %vm366_vm0, %v2097_v14 }
 0x36a   : > { %3728 = vmatprep.mubr.msk.bf16.mxu1 %vm366_vm0, %v2098_v42 }
 0x371   : > { %3729 = vmatmul.mubr.msk.bf16.gmra.mxu1 %vm366_vm0, %v2099_v22  ;;  %v5472_v22 = vld [vmem:[#allocation3_spill] sm:$0xff] }
 0x3b8   : > { %v3618_v29 = vpop.f32.mrf.mxu1 }
 0x3b9   : > { %v1560_v25 = vadd.f32 %v3618_v29, %v4221_v37 }
 0x3ba   : > { %v1431_v1 = vpop.f32.mrf.mxu1 }
 0x3bb   : > { %1592 = vst.msk [vmem:[#allocation2 + $0x10] sm:$0xff] %vm366_vm0, %v1560_v25  ;;  %v1558_v7 = vadd.f32 %v1431_v1, %v4224_v38  ;;  %v5473_v25 = vld [vmem:[#allocation4_spill] sm:$0xff] }
 0x3bc   : > { %v3619_v23 = vpop.f32.mrf.mxu1 }
 0x3bd   : > { %1590 = vst.msk [vmem:[#allocation2] sm:$0xff] %vm366_vm0, %v1558_v7  ;;  %v1561_v11 = vadd.f32 %v3619_v23, %v4226_v39  ;;  %v5474_v7 = vld [vmem:[#allocation5_spill] sm:$0xff] }
 0x3be   : > { %v1434_v9 = vpop.f32.mrf.mxu1 }
 0x3bf   : > { %1593 = vst.msk [vmem:[#allocation2 + $0x18] sm:$0xff] %vm366_vm0, %v1561_v11  ;;  %v1559_v32 = vadd.f32 %v1434_v9, %v4228_v40  ;;  %v5475_v11 = vld [vmem:[#allocation6_spill] sm:$0xff] }
 0x3c1   : > { %1591 = vst.msk [vmem:[#allocation2 + $0x8] sm:$0xff] %vm366_vm0, %v1559_v32  ;;  %v3622_v41 = vpop.f32.mrf.mxu1  ;;  %v5476_v32 = vld [vmem:[#allocation7_spill] sm:$0xff] }
 0x3c2   : > { %v1564_v37 = vadd.f32 %v3622_v41, %v4235_v44 }
 0x3c3   : > { %v1447_v2 = vpop.f32.mrf.mxu1 }
 0x3c4   : > { %1596 = vst.msk [vmem:[#allocation2 + $0x30] sm:$0xff] %vm366_vm0, %v1564_v37  ;;  %v1562_v38 = vadd.f32 %v1447_v2, %v4238_v45  ;;  %v5477_v2 = vld [vmem:[#allocation8_spill] sm:$0xff] }
 0x3c5   : > { %v3623_v34 = vpop.f32.mrf.mxu1 }
 0x3c6   : > { %1594 = vst.msk [vmem:[#allocation2 + $0x20] sm:$0xff] %vm366_vm0, %v1562_v38  ;;  %v1565_v39 = vadd.f32 %v3623_v34, %v4241_v46 }
 0x3c7   : > { %v1450_v59 = vpop.f32.mrf.mxu1 }
 0x3c8   : > { %1597 = vst.msk [vmem:[#allocation2 + $0x38] sm:$0xff] %vm366_vm0, %v1565_v39  ;;  %v1563_v40 = vadd.f32 %v1450_v59, %v4243_v47  ;;  %v5478_v39 = vld [vmem:[#allocation9_spill] sm:$0xff] }
 0x3c9   : > { %v3626_v61 = vpop.f32.mrf.mxu1 }
 0x3ca   : > { %1595 = vst.msk [vmem:[#allocation2 + $0x28] sm:$0xff] %vm366_vm0, %v1563_v40  ;;  %v1568_v44 = vadd.f32 %v3626_v61, %v4249_v50  ;;  %v5479_v61 = vld [vmem:[#allocation10_spill] sm:$0xff] }
 0x3cb   : > { %v1463_v60 = vpop.f32.mrf.mxu1 }
 0x3cc   : > { %1600 = vst.msk [vmem:[#allocation2 + $0x50] sm:$0xff] %vm366_vm0, %v1568_v44  ;;  %v1566_v45 = vadd.f32 %v1463_v60, %v4252_v51 }
 0x3cd   : > { %v3627_v4 = vpop.f32.mrf.mxu1 }
 0x3ce   : > { %1598 = vst.msk [vmem:[#allocation2 + $0x40] sm:$0xff] %vm366_vm0, %v1566_v45  ;;  %v1569_v46 = vadd.f32 %v3627_v4, %v4255_v52  ;;  %v5480_v45 = vld [vmem:[#allocation11_spill] sm:$0xff] }
 0x3cf   : > { %v1466_v15 = vpop.f32.mrf.mxu1 }
 0x3d0   : > { %1601 = vst.msk [vmem:[#allocation2 + $0x58] sm:$0xff] %vm366_vm0, %v1569_v46  ;;  %v1567_v47 = vadd.f32 %v1466_v15, %v4257_v53  ;;  %v5481_v15 = vld [vmem:[#allocation12_spill] sm:$0xff] }
 0x3d1   : > { %v3630_v42 = vpop.f32.mrf.mxu1 }
 0x3d2   : > { %1599 = vst.msk [vmem:[#allocation2 + $0x48] sm:$0xff] %vm366_vm0, %v1567_v47  ;;  %v1572_v50 = vadd.f32 %v3630_v42, %v4263_v56 }
 0x3d3   : > { %v1479_v14 = vpop.f32.mrf.mxu1 }
 0x3d4   : > { %1604 = vst.msk [vmem:[#allocation2 + $0x70] sm:$0xff] %vm366_vm0, %v1572_v50  ;;  %v1570_v51 = vadd.f32 %v1479_v14, %v5472_v22  ;;  %v5482_v50 = vld [vmem:[#allocation13_spill] sm:$0xff] }
 0x3d5   : > { %v3631_v29 = vpop.f32.mrf.mxu1 }
 0x3d6   : > { %1602 = vst.msk [vmem:[#allocation2 + $0x60] sm:$0xff] %vm366_vm0, %v1570_v51  ;;  %v1573_v52 = vadd.f32 %v3631_v29, %v5473_v25  ;;  %v5483_v51 = vld [vmem:[#allocation14_spill] sm:$0xff] }
 0x3d7   : > { %v1482_v1 = vpop.f32.mrf.mxu1 }
 0x3d8   : > { %1605 = vst.msk [vmem:[#allocation2 + $0x78] sm:$0xff] %vm366_vm0, %v1573_v52  ;;  %v1571_v53 = vadd.f32 %v1482_v1, %v5474_v7  ;;  %v5484_v52 = vld [vmem:[#allocation15_spill] sm:$0xff] }
 0x3d9   : > { %v3634_v23 = vpop.f32.mrf.mxu1 }
 0x3da   : > { %1603 = vst.msk [vmem:[#allocation2 + $0x68] sm:$0xff] %vm366_vm0, %v1571_v53  ;;  %v1576_v56 = vadd.f32 %v3634_v23, %v5475_v11  ;;  %v5485_v53 = vld [vmem:[#allocation16_spill] sm:$0xff] }
 0x3db   : > { %v1495_v9 = vpop.f32.mrf.mxu1 }
 0x3dc   : > { %1608 = vst.msk [vmem:[#allocation2 + $0x90] sm:$0xff] %vm366_vm0, %v1576_v56  ;;  %v1574_v41 = vadd.f32 %v1495_v9, %v5476_v32  ;;  %v5486_v56 = vld [vmem:[#allocation17_spill] sm:$0xff] }
 0x3dd   : > { %v3635_v37 = vpop.f32.mrf.mxu1 }
 0x3de   : > { %1606 = vst.msk [vmem:[#allocation2 + $0x80] sm:$0xff] %vm366_vm0, %v1574_v41  ;;  %v1577_v38 = vadd.f32 %v3635_v37, %v5477_v2  ;;  %v5487_v41 = vld [vmem:[#allocation18_spill] sm:$0xff] }
 0x3df   : > { %v1498_v34 = vpop.f32.mrf.mxu1 }
 0x3e0   : > { %1609 = vst.msk [vmem:[#allocation2 + $0x98] sm:$0xff] %vm366_vm0, %v1577_v38  ;;  %v1575_v59 = vadd.f32 %v1498_v34, %v5478_v39  ;;  %v5488_v38 = vld [vmem:[#allocation19_spill] sm:$0xff] }
 0x3e1   : > { %v3638_v40 = vpop.f32.mrf.mxu1 }
 0x3e2   : > { %1607 = vst.msk [vmem:[#allocation2 + $0x88] sm:$0xff] %vm366_vm0, %v1575_v59  ;;  %v1580_v44 = vadd.f32 %v3638_v40, %v5479_v61  ;;  %v5489_v59 = vld [vmem:[#allocation20_spill] sm:$0xff] }
 0x3e3   : > { %v1511_v60 = vpop.f32.mrf.mxu1 }
 0x3e4   : > { %1612 = vst.msk [vmem:[#allocation2 + $0xb0] sm:$0xff] %vm366_vm0, %v1580_v44  ;;  %v1578_v4 = vadd.f32 %v1511_v60, %v5480_v45  ;;  %v5490_v44 = vld [vmem:[#allocation21_spill] sm:$0xff] }
 0x3e5   : > { %v3639_v46 = vpop.f32.mrf.mxu1 }
 0x3e6   : > { %1610 = vst.msk [vmem:[#allocation2 + $0xa0] sm:$0xff] %vm366_vm0, %v1578_v4  ;;  %v1581_v47 = vadd.f32 %v3639_v46, %v5481_v15 }
 0x3e7   : > { %v1514_v42 = vpop.f32.mrf.mxu1 }
 0x3e8   : > { %1613 = vst.msk [vmem:[#allocation2 + $0xb8] sm:$0xff] %vm366_vm0, %v1581_v47  ;;  %v1579_v14 = vadd.f32 %v1514_v42, %v5482_v50 }
 0x3e9   : > { %v3642_v22 = vpop.f32.mrf.mxu1 }
 0x3ea   : > { %1611 = vst.msk [vmem:[#allocation2 + $0xa8] sm:$0xff] %vm366_vm0, %v1579_v14  ;;  %v1584_v29 = vadd.f32 %v3642_v22, %v5483_v51 }
 0x3eb   : > { %v1527_v25 = vpop.f32.mrf.mxu1 }
 0x3ec   : > { %1616 = vst.msk [vmem:[#allocation2 + $0xd0] sm:$0xff] %vm366_vm0, %v1584_v29  ;;  %v1582_v1 = vadd.f32 %v1527_v25, %v5484_v52 }
 0x3ed   : > { %v3643_v7 = vpop.f32.mrf.mxu1 }
 0x3ee   : > { %1614 = vst.msk [vmem:[#allocation2 + $0xc0] sm:$0xff] %vm366_vm0, %v1582_v1  ;;  %v1585_v23 = vadd.f32 %v3643_v7, %v5485_v53 }
 0x3ef   : > { %v1530_v11 = vpop.f32.mrf.mxu1 }
 0x3f0   : > { %1617 = vst.msk [vmem:[#allocation2 + $0xd8] sm:$0xff] %vm366_vm0, %v1585_v23  ;;  %v1583_v9 = vadd.f32 %v1530_v11, %v5486_v56 }
 0x3f1   : > { %v3646_v32 = vpop.f32.mrf.mxu1 }
 0x3f2   : > { %1615 = vst.msk [vmem:[#allocation2 + $0xc8] sm:$0xff] %vm366_vm0, %v1583_v9  ;;  %v1588_v37 = vadd.f32 %v3646_v32, %v5487_v41 }
 0x3f3   : > { %v1543_v2 = vpop.f32.mrf.mxu1 }
 0x3f4   : > { %1620 = vst.msk [vmem:[#allocation2 + $0xf0] sm:$0xff] %vm366_vm0, %v1588_v37  ;;  %v1586_v34 = vadd.f32 %v1543_v2, %v5488_v38 }
 0x3f5   : > { %v3647_v39 = vpop.f32.mrf.mxu1 }
 0x3f6   : > { %1618 = vst.msk [vmem:[#allocation2 + $0xe0] sm:$0xff] %vm366_vm0, %v1586_v34  ;;  %v1589_v40 = vadd.f32 %v3647_v39, %v5489_v59 }
 0x3f7   : > { %v1546_v61 = vpop.f32.mrf.mxu1 }
 0x3f8   : > { %1621 = vst.msk [vmem:[#allocation2 + $0xf8] sm:$0xff] %vm366_vm0, %v1589_v40  ;;  %v1587_v60 = vadd.f32 %v1546_v61, %v5490_v44 }
 0x3f9   : > { %v4916_v45 = vpop.f32.mrf.mxu1 }
 0x3fa   : > { %1619 = vst.msk [vmem:[#allocation2 + $0xe8] sm:$0xff] %vm366_vm0, %v1587_v60  ;;  %v2315_v42 = vsel %vm974_vm1, %v4916_v45, -inf }
 0x3fb   : > { %v4919_v4 = vpop.f32.mrf.mxu1 }
 0x3fc   : > { %v2309_v46 = vsel %vm974_vm1, %v4919_v4, -inf }
 0x3fd   : > { %2310 = vmax.xlane.f32.xlu0 %v2309_v46  ;;  %v4923_v15 = vpop.f32.mrf.mxu1 }
 0x3fe   : > { %v2318_v51 = vsel %vm974_vm1, %v4923_v15, -inf }
 0x3ff   : > { %v4925_v47 = vpop.f32.mrf.mxu1 }
 0x400   : > { %v2312_v50 = vsel %vm974_vm1, %v4925_v47, -inf }
 0x401   : > { %2316 = vmax.xlane.f32.xlu0 %v2315_v42  ;;  %2313 = vmax.xlane.f32.xlu1 %v2312_v50  ;;  %v4931_v14 = vpop.f32.mrf.mxu1 }
 0x402   : > { %v2327_v1 = vsel %vm974_vm1, %v4931_v14, -inf }
 0x403   : > { %v4933_v22 = vpop.f32.mrf.mxu1 }
 0x404   : > { %v2321_v29 = vsel %vm974_vm1, %v4933_v22, -inf }
 0x405   : > { %2319 = vmax.xlane.f32.xlu1 %v2318_v51  ;;  %2322 = vmax.xlane.f32.xlu0 %v2321_v29  ;;  %v4939_v25 = vpop.f32.mrf.mxu1 }
 0x406   : > { %v2330_v11 = vsel %vm974_vm1, %v4939_v25, -inf }
 0x407   : > { %v4941_v52 = vpop.f32.mrf.mxu1 }
 0x408   : > { %v2324_v7 = vsel %vm974_vm1, %v4941_v52, -inf }
 0x409   : > { %2328 = vmax.xlane.f32.xlu0 %v2327_v1  ;;  %2325 = vmax.xlane.f32.xlu1 %v2324_v7  ;;  %v4947_v53 = vpop.f32.mrf.mxu1 }
 0x40a   : > { %v2339_v41 = vsel %vm974_vm1, %v4947_v53, -inf }
 0x40b   : > { %v4949_v23 = vpop.f32.mrf.mxu1 }
 0x40c   : > { %v2333_v56 = vsel %vm974_vm1, %v4949_v23, -inf }
 0x40d   : > { %2331 = vmax.xlane.f32.xlu1 %v2330_v11  ;;  %2334 = vmax.xlane.f32.xlu0 %v2333_v56  ;;  %v4955_v9 = vpop.f32.mrf.mxu1 }
 0x40e   : > { %v2342_v34 = vsel %vm974_vm1, %v4955_v9, -inf }
 0x40f   : > { %v4957_v32 = vpop.f32.mrf.mxu1 }
 0x410   : > { %v2336_v37 = vsel %vm974_vm1, %v4957_v32, -inf }
 0x411   : > { %2340 = vmax.xlane.f32.xlu0 %v2339_v41  ;;  %2337 = vmax.xlane.f32.xlu1 %v2336_v37  ;;  %v4963_v2 = vpop.f32.mrf.mxu1 }
 0x412   : > { %v2351_v61 = vsel %vm974_vm1, %v4963_v2, -inf }
 0x413   : > { %v4965_v38 = vpop.f32.mrf.mxu1 }
 0x414   : > { %v2345_v39 = vsel %vm974_vm1, %v4965_v38, -inf }
 0x415   : > { %2343 = vmax.xlane.f32.xlu1 %v2342_v34  ;;  %2346 = vmax.xlane.f32.xlu0 %v2345_v39  ;;  %v4971_v59 = vpop.f32.mrf.mxu1 }
 0x416   : > { %v2354_v42 = vsel %vm974_vm1, %v4971_v59, -inf }
 0x417   : > { %v4973_v40 = vpop.f32.mrf.mxu1 }
 0x418   : > { %v2348_v44 = vsel %vm974_vm1, %v4973_v40, -inf }
 0x419   : > { %2352 = vmax.xlane.f32.xlu0 %v2351_v61  ;;  %2349 = vmax.xlane.f32.xlu1 %v2348_v44  ;;  %v4979_v60 = vpop.f32.mrf.mxu1 }
 0x41a   : > { %v2363_v1 = vsel %vm974_vm1, %v4979_v60, -inf }
 0x41b   : > { %v4981_v46 = vpop.f32.mrf.mxu1 }
 0x41c   : > { %v2357_v50 = vsel %vm974_vm1, %v4981_v46, -inf }
 0x41d   : > { %2355 = vmax.xlane.f32.xlu1 %v2354_v42  ;;  %2358 = vmax.xlane.f32.xlu0 %v2357_v50  ;;  %v4987_v51 = vpop.f32.mrf.mxu1 }
 0x41e   : > { %v2366_v41 = vsel %vm974_vm1, %v4987_v51, -inf }
 0x41f   : > { %v4989_v29 = vpop.f32.mrf.mxu1 }
 0x420   : > { %v2360_v7 = vsel %vm974_vm1, %v4989_v29, -inf }
 0x421   : > { %2364 = vmax.xlane.f32.xlu0 %v2363_v1  ;;  %2361 = vmax.xlane.f32.xlu1 %v2360_v7  ;;  %v4995_v11 = vpop.f32.mrf.mxu1 }
 0x422   : > { %v2375_v61 = vsel %vm974_vm1, %v4995_v11, -inf }
 0x423   : > { %v4997_v56 = vpop.f32.mrf.mxu1 }
 0x424   : > { %v2369_v37 = vsel %vm974_vm1, %v4997_v56, -inf }
 0x425   : > { %2367 = vmax.xlane.f32.xlu1 %v2366_v41  ;;  %2370 = vmax.xlane.f32.xlu0 %v2369_v37  ;;  %v5003_v34 = vpop.f32.mrf.mxu1 }
 0x426   : > { %v2378_v1 = vsel %vm974_vm1, %v5003_v34, -inf }
 0x427   : > { %v5005_v39 = vpop.f32.mrf.mxu1 }
 0x428   : > { %v2372_v44 = vsel %vm974_vm1, %v5005_v39, -inf }
 0x429   : > { %2376 = vmax.xlane.f32.xlu0 %v2375_v61  ;;  %2373 = vmax.xlane.f32.xlu1 %v2372_v44  ;;  %v5011_v42 = vpop.f32.mrf.mxu1 }
 0x42a   : > { %v2387_v61 = vsel %vm974_vm1, %v5011_v42, -inf }
 0x42b   : > { %v5013_v50 = vpop.f32.mrf.mxu1 }
 0x42c   : > { %v2381_v7 = vsel %vm974_vm1, %v5013_v50, -inf }
 0x42d   : > { %2379 = vmax.xlane.f32.xlu1 %v2378_v1  ;;  %2382 = vmax.xlane.f32.xlu0 %v2381_v7  ;;  %v5019_v41 = vpop.f32.mrf.mxu1 }
 0x42e   : > { %v2390_v1 = vsel %vm974_vm1, %v5019_v41, -inf }
 0x42f   : > { %v5021_v37 = vpop.f32.mrf.mxu1 }
 0x430   : > { %v2384_v44 = vsel %vm974_vm1, %v5021_v37, -inf }
 0x431   : > { %2388 = vmax.xlane.f32.xlu0 %v2387_v61  ;;  %2385 = vmax.xlane.f32.xlu1 %v2384_v44  ;;  %v5027_v31 = vpop.f32.mrf.mxu1 }
 0x432   : > { %v2399_v61 = vsel %vm974_vm1, %v5027_v31, -inf }
 0x433   : > { %v5029_v62 = vpop.f32.mrf.mxu1 }
 0x434   : > { %v2393_v7 = vsel %vm974_vm1, %v5029_v62, -inf }
 0x435   : > { %2391 = vmax.xlane.f32.xlu1 %v2390_v1  ;;  %2394 = vmax.xlane.f32.xlu0 %v2393_v7  ;;  %v5035_v5 = vpop.f32.mrf.mxu1 }
 0x436   : > { %v2402_v17 = vsel %vm974_vm1, %v5035_v5, -inf }
 0x437   : > { %v5037_v13 = vpop.f32.mrf.mxu1 }
 0x438   : > { %v2396_v44 = vsel %vm974_vm1, %v5037_v13, -inf }
 0x439   : > { %2400 = vmax.xlane.f32.xlu0 %v2399_v61  ;;  %2397 = vmax.xlane.f32.xlu1 %v2396_v44 }
 0x43d   : > { %2403 = vmax.xlane.f32.xlu1 %v2402_v17 }
 0x486   : > { %v2311_v19 = vpop.xlane.xlu0 %2310 }
 0x487   : > { %v2405_v1 = vsub.f32 %v4919_v4, %v2311_v19 }
 0x489   : > { %v2437_v7 = vmul.f32 1.442695, %v2405_v1 }
 0x48a   : > { %v2317_v6 = vpop.xlane.xlu0 %2316  ;;  %v2314_v8 = vpop.xlane.xlu1 %2313 }
 0x48b   : > { %3966 = vpow2.f32 %v2437_v7  ;;  %v2407_v30 = vsub.f32 %v4916_v45, %v2317_v6  ;;  %v2406_v35 = vsub.f32 %v4925_v47, %v2314_v8 }
 0x48d   : > { %v2441_v26 = vmul.f32 1.442695, %v2407_v30  ;;  %v2439_v28 = vmul.f32 1.442695, %v2406_v35 }
 0x48e   : > { %v2320_v20 = vpop.xlane.xlu1 %2319  ;;  %v2323_v61 = vpop.xlane.xlu0 %2322 }
 0x48f   : > { %3968 = vpow2.f32 %v2441_v26  ;;  %v2408_v44 = vsub.f32 %v4923_v15, %v2320_v20  ;;  %v2409_v17 = vsub.f32 %v4933_v22, %v2323_v61 }
 0x490   : > { %3970 = vpow2.f32 %v2439_v28 }
 0x491   : > { %v2443_v36 = vmul.f32 1.442695, %v2408_v44  ;;  %v2445_v19 = vmul.f32 1.442695, %v2409_v17 }
 0x492   : > { %v2329_v4 = vpop.xlane.xlu0 %2328  ;;  %v2326_v1 = vpop.xlane.xlu1 %2325 }
 0x493   : > { %3972 = vpow2.f32 %v2443_v36  ;;  %v2411_v7 = vsub.f32 %v4931_v14, %v2329_v4  ;;  %v2410_v6 = vsub.f32 %v4941_v52, %v2326_v1 }
 0x494   : > { %3974 = vpow2.f32 %v2445_v19 }
 0x495   : > { %v2449_v30 = vmul.f32 1.442695, %v2411_v7  ;;  %v2447_v35 = vmul.f32 1.442695, %v2410_v6 }
 0x496   : > { %v2332_v8 = vpop.xlane.xlu1 %2331  ;;  %v2335_v45 = vpop.xlane.xlu0 %2334 }
 0x497   : > { %3976 = vpow2.f32 %v2449_v30  ;;  %v2412_v20 = vsub.f32 %v4939_v25, %v2332_v8  ;;  %v2413_v26 = vsub.f32 %v4949_v23, %v2335_v45 }
 0x498   : > { %v5054_v28 = vpop.eup %3966  ;;  %3978 = vpow2.f32 %v2447_v35 }
 0x499   : > { %v2451_v15 = vmul.f32 1.442695, %v2412_v20  ;;  %v2453_v47 = vmul.f32 1.442695, %v2413_v26  ;;  %v2501_v36 = vsel %vm974_vm1, %v5054_v28, 0.0 }
 0x49a   : > { %v2341_v14 = vpop.xlane.xlu0 %2340  ;;  %v2338_v22 = vpop.xlane.xlu1 %2337  ;;  %2502 = vadd.xlane.f32.xlu0 %v2501_v36 }
 0x49b   : > { %3980 = vpow2.f32 %v2451_v15  ;;  %v2415_v52 = vsub.f32 %v4947_v53, %v2341_v14  ;;  %v2414_v61 = vsub.f32 %v4957_v32, %v2338_v22 }
 0x49c   : > { %v5060_v44 = vpop.eup %3968  ;;  %3982 = vpow2.f32 %v2453_v47 }
 0x49d   : > { %v5062_v25 = vpop.eup %3970  ;;  %v2457_v23 = vmul.f32 1.442695, %v2415_v52  ;;  %v2455_v17 = vmul.f32 1.442695, %v2414_v61  ;;  %v2507_v19 = vsel %vm974_vm1, %v5060_v44, 0.0 }
 0x49e   : > { %v2344_v4 = vpop.xlane.xlu1 %2343  ;;  %v2347_v1 = vpop.xlane.xlu0 %2346  ;;  %2508 = vadd.xlane.f32.xlu0 %v2507_v19  ;;  %v2504_v7 = vsel %vm974_vm1, %v5062_v25, 0.0 }
 0x49f   : > { %3984 = vpow2.f32 %v2457_v23  ;;  %v2416_v53 = vsub.f32 %v4955_v9, %v2344_v4  ;;  %v2417_v32 = vsub.f32 %v4965_v38, %v2347_v1  ;;  %2505 = vadd.xlane.f32.xlu1 %v2504_v7 }
 0x4a0   : > { %v5070_v6 = vpop.eup %3972  ;;  %3986 = vpow2.f32 %v2455_v17 }
 0x4a1   : > { %v5072_v30 = vpop.eup %3974  ;;  %v2459_v35 = vmul.f32 1.442695, %v2416_v53  ;;  %v2461_v8 = vmul.f32 1.442695, %v2417_v32  ;;  %v2510_v45 = vsel %vm974_vm1, %v5070_v6, 0.0 }
 0x4a2   : > { %v2353_v20 = vpop.xlane.xlu0 %2352  ;;  %v2350_v26 = vpop.xlane.xlu1 %2349  ;;  %v2513_v15 = vsel %vm974_vm1, %v5072_v30, 0.0 }
 0x4a3   : > { %3988 = vpow2.f32 %v2459_v35  ;;  %v2419_v9 = vsub.f32 %v4963_v2, %v2353_v20  ;;  %v2418_v38 = vsub.f32 %v4973_v40, %v2350_v26  ;;  %2514 = vadd.xlane.f32.xlu0 %v2513_v15  ;;  %2511 = vadd.xlane.f32.xlu1 %v2510_v45 }
 0x4a4   : > { %v5080_v47 = vpop.eup %3976  ;;  %3990 = vpow2.f32 %v2461_v8 }
 0x4a5   : > { %v5082_v36 = vpop.eup %3978  ;;  %v2465_v14 = vmul.f32 1.442695, %v2419_v9  ;;  %v2463_v22 = vmul.f32 1.442695, %v2418_v38  ;;  %v2519_v52 = vsel %vm974_vm1, %v5080_v47, 0.0 }
 0x4a6   : > { %v2356_v61 = vpop.xlane.xlu1 %2355  ;;  %v2359_v23 = vpop.xlane.xlu0 %2358  ;;  %v2516_v17 = vsel %vm974_vm1, %v5082_v36, 0.0 }
 0x4a7   : > { %3992 = vpow2.f32 %v2465_v14  ;;  %v2420_v2 = vsub.f32 %v4971_v59, %v2356_v61  ;;  %v2421_v40 = vsub.f32 %v4981_v46, %v2359_v23  ;;  %2520 = vadd.xlane.f32.xlu0 %v2519_v52  ;;  %2517 = vadd.xlane.f32.xlu1 %v2516_v17 }
 0x4a8   : > { %v5090_v19 = vpop.eup %3980  ;;  %3994 = vpow2.f32 %v2463_v22 }
 0x4a9   : > { %v5092_v4 = vpop.eup %3982  ;;  %v2467_v1 = vmul.f32 1.442695, %v2420_v2  ;;  %v2469_v7 = vmul.f32 1.442695, %v2421_v40  ;;  %v2522_v53 = vsel %vm974_vm1, %v5090_v19, 0.0 }
 0x4aa   : > { %v2365_v32 = vpop.xlane.xlu0 %2364  ;;  %v2362_v35 = vpop.xlane.xlu1 %2361  ;;  %v2525_v8 = vsel %vm974_vm1, %v5092_v4, 0.0 }
 0x4ab   : > { %3996 = vpow2.f32 %v2467_v1  ;;  %v2423_v59 = vsub.f32 %v4979_v60, %v2365_v32  ;;  %v2422_v46 = vsub.f32 %v4989_v29, %v2362_v35  ;;  %2526 = vadd.xlane.f32.xlu0 %v2525_v8  ;;  %2523 = vadd.xlane.f32.xlu1 %v2522_v53 }
 0x4ac   : > { %v5100_v45 = vpop.eup %3984  ;;  %3998 = vpow2.f32 %v2469_v7 }
 0x4ad   : > { %v5102_v20 = vpop.eup %3986  ;;  %v2473_v26 = vmul.f32 1.442695, %v2423_v59  ;;  %v2471_v15 = vmul.f32 1.442695, %v2422_v46  ;;  %v2531_v9 = vsel %vm974_vm1, %v5100_v45, 0.0 }
 0x4ae   : > { %v2368_v38 = vpop.xlane.xlu1 %2367  ;;  %v2371_v14 = vpop.xlane.xlu0 %2370  ;;  %v2528_v22 = vsel %vm974_vm1, %v5102_v20, 0.0 }
 0x4af   : > { %4000 = vpow2.f32 %v2473_v26  ;;  %v2424_v60 = vsub.f32 %v4987_v51, %v2368_v38  ;;  %v2425_v29 = vsub.f32 %v4997_v56, %v2371_v14  ;;  %2532 = vadd.xlane.f32.xlu0 %v2531_v9  ;;  %2529 = vadd.xlane.f32.xlu1 %v2528_v22 }
 0x4b0   : > { %v5110_v52 = vpop.eup %3988  ;;  %4002 = vpow2.f32 %v2471_v15 }
 0x4b1   : > { %v5112_v61 = vpop.eup %3990  ;;  %v2475_v23 = vmul.f32 1.442695, %v2424_v60  ;;  %v2477_v17 = vmul.f32 1.442695, %v2425_v29  ;;  %v2534_v2 = vsel %vm974_vm1, %v5110_v52, 0.0 }
 0x4b2   : > { %v2377_v40 = vpop.xlane.xlu0 %2376  ;;  %v2374_v1 = vpop.xlane.xlu1 %2373  ;;  %v2537_v7 = vsel %vm974_vm1, %v5112_v61, 0.0 }
 0x4b3   : > { %4004 = vpow2.f32 %v2475_v23  ;;  %v2427_v51 = vsub.f32 %v4995_v11, %v2377_v40  ;;  %v2426_v56 = vsub.f32 %v5005_v39, %v2374_v1  ;;  %2538 = vadd.xlane.f32.xlu0 %v2537_v7  ;;  %2535 = vadd.xlane.f32.xlu1 %v2534_v2 }
 0x4b4   : > { %v5120_v53 = vpop.eup %3992  ;;  %4006 = vpow2.f32 %v2477_v17 }
 0x4b5   : > { %v5122_v32 = vpop.eup %3994  ;;  %v2481_v35 = vmul.f32 1.442695, %v2427_v51  ;;  %v2479_v8 = vmul.f32 1.442695, %v2426_v56  ;;  %v2543_v59 = vsel %vm974_vm1, %v5120_v53, 0.0 }
 0x4b6   : > { %v2380_v46 = vpop.xlane.xlu1 %2379  ;;  %v2383_v26 = vpop.xlane.xlu0 %2382  ;;  %v2540_v15 = vsel %vm974_vm1, %v5122_v32, 0.0 }
 0x4b7   : > { %4008 = vpow2.f32 %v2481_v35  ;;  %v2428_v11 = vsub.f32 %v5003_v34, %v2380_v46  ;;  %v2429_v39 = vsub.f32 %v5013_v50, %v2383_v26  ;;  %2544 = vadd.xlane.f32.xlu0 %v2543_v59  ;;  %2541 = vadd.xlane.f32.xlu1 %v2540_v15 }
 0x4b8   : > { %v5130_v9 = vpop.eup %3996  ;;  %4010 = vpow2.f32 %v2479_v8 }
 0x4b9   : > { %v5132_v38 = vpop.eup %3998  ;;  %v2483_v14 = vmul.f32 1.442695, %v2428_v11  ;;  %v2485_v22 = vmul.f32 1.442695, %v2429_v39  ;;  %v2546_v60 = vsel %vm974_vm1, %v5130_v9, 0.0 }
 0x4ba   : > { %v2389_v29 = vpop.xlane.xlu0 %2388  ;;  %v2386_v23 = vpop.xlane.xlu1 %2385  ;;  %v2549_v17 = vsel %vm974_vm1, %v5132_v38, 0.0 }
 0x4bb   : > { %4012 = vpow2.f32 %v2483_v14  ;;  %v2431_v34 = vsub.f32 %v5011_v42, %v2389_v29  ;;  %v2430_v50 = vsub.f32 %v5021_v37, %v2386_v23  ;;  %2550 = vadd.xlane.f32.xlu0 %v2549_v17  ;;  %2547 = vadd.xlane.f32.xlu1 %v2546_v60 }
 0x4bc   : > { %v5140_v2 = vpop.eup %4000  ;;  %4014 = vpow2.f32 %v2485_v22 }
 0x4bd   : > { %v5142_v40 = vpop.eup %4002  ;;  %v2489_v1 = vmul.f32 1.442695, %v2431_v34  ;;  %v2487_v7 = vmul.f32 1.442695, %v2430_v50  ;;  %v2555_v51 = vsel %vm974_vm1, %v5140_v2, 0.0 }
 0x4be   : > { %v2392_v56 = vpop.xlane.xlu1 %2391  ;;  %v2395_v35 = vpop.xlane.xlu0 %2394  ;;  %v2552_v8 = vsel %vm974_vm1, %v5142_v40, 0.0 }
 0x4bf   : > { %4016 = vpow2.f32 %v2489_v1  ;;  %v2432_v42 = vsub.f32 %v5019_v41, %v2392_v56  ;;  %2556 = vadd.xlane.f32.xlu0 %v2555_v51  ;;  %v2433_v37 = vsub.f32 %v5029_v62, %v2395_v35  ;;  %2553 = vadd.xlane.f32.xlu1 %v2552_v8 }
 0x4c0   : > { %v5150_v59 = vpop.eup %4004  ;;  %4018 = vpow2.f32 %v2487_v7 }
 0x4c1   : > { %v5152_v46 = vpop.eup %4006  ;;  %v2491_v26 = vmul.f32 1.442695, %v2432_v42  ;;  %v2493_v15 = vmul.f32 1.442695, %v2433_v37  ;;  %v2558_v11 = vsel %vm974_vm1, %v5150_v59, 0.0 }
 0x4c2   : > { %v2561_v39 = vsel %vm974_vm1, %v5152_v46, 0.0  ;;  %v2401_v14 = vpop.xlane.xlu0 %2400  ;;  %v2398_v22 = vpop.xlane.xlu1 %2397 }
 0x4c3   : > { %4020 = vpow2.f32 %v2491_v26  ;;  %2562 = vadd.xlane.f32.xlu0 %v2561_v39  ;;  %v2435_v62 = vsub.f32 %v5027_v31, %v2401_v14  ;;  %2559 = vadd.xlane.f32.xlu1 %v2558_v11  ;;  %v2434_v41 = vsub.f32 %v5037_v13, %v2398_v22 }
 0x4c4   : > { %v5160_v60 = vpop.eup %4008  ;;  %4022 = vpow2.f32 %v2493_v15 }
 0x4c5   : > { %v5162_v29 = vpop.eup %4010  ;;  %v2497_v23 = vmul.f32 1.442695, %v2435_v62  ;;  %v2495_v17 = vmul.f32 1.442695, %v2434_v41  ;;  %v2567_v34 = vsel %vm974_vm1, %v5160_v60, 0.0 }
 0x4c6   : > { %v2564_v50 = vsel %vm974_vm1, %v5162_v29, 0.0  ;;  %v2404_v1 = vpop.xlane.xlu1 %2403 }
 0x4c7   : > { %4024 = vpow2.f32 %v2497_v23  ;;  %2568 = vadd.xlane.f32.xlu0 %v2567_v34  ;;  %2565 = vadd.xlane.f32.xlu1 %v2564_v50  ;;  %v2436_v31 = vsub.f32 %v5035_v5, %v2404_v1 }
 0x4c8   : > { %v5169_v13 = vpop.eup %4012  ;;  %4026 = vpow2.f32 %v2495_v17 }
 0x4c9   : > { %v5171_v7 = vpop.eup %4014  ;;  %v2499_v51 = vmul.f32 1.442695, %v2436_v31  ;;  %v2570_v56 = vsel %vm974_vm1, %v5169_v13, 0.0 }
 0x4ca   : > { %v2573_v35 = vsel %vm974_vm1, %v5171_v7, 0.0 }
 0x4cb   : > { %4028 = vpow2.f32 %v2499_v51  ;;  %2574 = vadd.xlane.f32.xlu0 %v2573_v35  ;;  %2571 = vadd.xlane.f32.xlu1 %v2570_v56 }
 0x4cc   : > { %v5177_v8 = vpop.eup %4016 }
 0x4cd   : > { %v5179_v42 = vpop.eup %4018  ;;  %v2579_v5 = vsel %vm974_vm1, %v5177_v8, 0.0 }
 0x4ce   : > { %v2576_v37 = vsel %vm974_vm1, %v5179_v42, 0.0 }
 0x4cf   : > { %2580 = vadd.xlane.f32.xlu0 %v2579_v5  ;;  %2577 = vadd.xlane.f32.xlu1 %v2576_v37 }
 0x4d0   : > { %v5185_v26 = vpop.eup %4020 }
 0x4d1   : > { %v5187_v15 = vpop.eup %4022  ;;  %v2582_v11 = vsel %vm974_vm1, %v5185_v26, 0.0 }
 0x4d2   : > { %v2585_v39 = vsel %vm974_vm1, %v5187_v15, 0.0 }
 0x4d3   : > { %2586 = vadd.xlane.f32.xlu0 %v2585_v39  ;;  %2583 = vadd.xlane.f32.xlu1 %v2582_v11 }
 0x4d4   : > { %v5193_v14 = vpop.eup %4024 }
 0x4d5   : > { %v5195_v22 = vpop.eup %4026  ;;  %v2591_v62 = vsel %vm974_vm1, %v5193_v14, 0.0 }
 0x4d6   : > { %v2588_v41 = vsel %vm974_vm1, %v5195_v22, 0.0 }
 0x4d7   : > { %2592 = vadd.xlane.f32.xlu0 %v2591_v62  ;;  %2589 = vadd.xlane.f32.xlu1 %v2588_v41 }
 0x4d8   : > { %v5201_v23 = vpop.eup %4028 }
 0x4d9   : > { %v2594_v17 = vsel %vm974_vm1, %v5201_v23, 0.0 }
 0x4db   : > { %2595 = vadd.xlane.f32.xlu1 %v2594_v17 }
 0x523   : > { %v2503_v34 = vpop.xlane.xlu0 %2502 }
 0x524   : > { %4030 = vrcp.f32 %v2503_v34 }
 0x527   : > { %v2509_v50 = vpop.xlane.xlu0 %2508 }
 0x528   : > { %v2506_v1 = vpop.xlane.xlu1 %2505 }
 0x529   : > { %4032 = vrcp.f32 %v2506_v1 }
 0x52a   : > { %4034 = vrcp.f32 %v2509_v50 }
 0x52c   : > { %v2515_v31 = vpop.xlane.xlu0 %2514  ;;  %v2512_v51 = vpop.xlane.xlu1 %2511 }
 0x52d   : > { %4036 = vrcp.f32 %v2512_v51 }
 0x52e   : > { %4038 = vrcp.f32 %v2515_v31 }
 0x530   : > { %v2521_v56 = vpop.xlane.xlu0 %2520  ;;  %v2518_v35 = vpop.xlane.xlu1 %2517 }
 0x531   : > { %4040 = vrcp.f32 %v2518_v35  ;;  %v4031_v5 = vpop.eup %4030 }
 0x532   : > { %4042 = vrcp.f32 %v2521_v56  ;;  %v2629_v62 = vmul.f32 %v4031_v5, %v5054_v28 }
 0x534   : > { %v2527_v37 = vpop.xlane.xlu0 %2526  ;;  %v2524_v11 = vpop.xlane.xlu1 %2523 }
 0x535   : > { %4044 = vrcp.f32 %v2524_v11 }
 0x536   : > { %v4033_v39 = vpop.eup %4032  ;;  %4046 = vrcp.f32 %v2527_v37 }
 0x537   : > { %v2630_v41 = vmul.f32 %v4033_v39, %v5062_v25  ;;  %v4035_v50 = vpop.eup %4034 }
 0x538   : > { %v2533_v17 = vpop.xlane.xlu0 %2532  ;;  %v2530_v34 = vpop.xlane.xlu1 %2529  ;;  %v2631_v51 = vmul.f32 %v4035_v50, %v5060_v44 }
 0x539   : > { %v2661_v1 = vpack.c.bf16 %v2630_v41, %v2629_v62  ;;  %4048 = vrcp.f32 %v2530_v34 }
 0x53a   : > { %v4037_v31 = vpop.eup %4036  ;;  %4050 = vrcp.f32 %v2533_v17 }
 0x53b   : > { %3736 = vmatprep.mubr.msk.bf16.mxu0 %vm974_vm1, %v2661_v1  ;;  %v2632_v56 = vmul.f32 %v4037_v31, %v5070_v6  ;;  %v4039_v49 = vpop.eup %4038 }
 0x53c   : > { %v2539_v35 = vpop.xlane.xlu0 %2538  ;;  %v2536_v11 = vpop.xlane.xlu1 %2535  ;;  %v2633_v39 = vmul.f32 %v4039_v49, %v5072_v30 }
 0x53d   : > { %v2662_v28 = vpack.c.bf16 %v2632_v56, %v2631_v51  ;;  %4052 = vrcp.f32 %v2536_v11 }
 0x53e   : > { %v4041_v25 = vpop.eup %4040  ;;  %4054 = vrcp.f32 %v2539_v35 }
 0x53f   : > { %3737 = vmatmul.mubr.msk.bf16.vlgmr.msra.gmra.mxu0 %vm974_vm1, %v2662_v28  ;;  %v2634_v62 = vmul.f32 %v4041_v25, %v5082_v36  ;;  %v4043_v41 = vpop.eup %4042 }
 0x540   : > { %v2545_v5 = vpop.xlane.xlu0 %2544  ;;  %v2542_v37 = vpop.xlane.xlu1 %2541  ;;  %v2635_v50 = vmul.f32 %v4043_v41, %v5080_v47 }
 0x541   : > { %4056 = vrcp.f32 %v2542_v37  ;;  %v2663_v44 = vpack.c.bf16 %v2634_v62, %v2633_v39 }
 0x542   : > { %v4045_v6 = vpop.eup %4044  ;;  %4058 = vrcp.f32 %v2545_v5 }
 0x543   : > { %3740 = vmatprep.mubr.msk.bf16.mxu0 %vm974_vm1, %v2663_v44  ;;  %v2636_v1 = vmul.f32 %v4045_v6, %v5090_v19  ;;  %v4047_v31 = vpop.eup %4046 }
 0x544   : > { %v2551_v17 = vpop.xlane.xlu0 %2550  ;;  %v2548_v34 = vpop.xlane.xlu1 %2547  ;;  %v2637_v36 = vmul.f32 %v4047_v31, %v5092_v4 }
 0x545   : > { %4060 = vrcp.f32 %v2548_v34  ;;  %v2664_v51 = vpack.c.bf16 %v2636_v1, %v2635_v50 }
 0x546   : > { %v4049_v56 = vpop.eup %4048  ;;  %4062 = vrcp.f32 %v2551_v17 }
 0x547   : > { %3741 = vmatmul.mubr.msk.bf16.gmra.mxu0 %vm974_vm1, %v2664_v51  ;;  %v2638_v35 = vmul.f32 %v4049_v56, %v5102_v20  ;;  %v4051_v11 = vpop.eup %4050 }
 0x548   : > { %v2557_v49 = vpop.xlane.xlu0 %2556  ;;  %v2554_v30 = vpop.xlane.xlu1 %2553  ;;  %v2639_v5 = vmul.f32 %v4051_v11, %v5100_v45 }
 0x549   : > { %4064 = vrcp.f32 %v2554_v30  ;;  %v2665_v28 = vpack.c.bf16 %v2638_v35, %v2637_v36 }
 0x54a   : > { %v4053_v25 = vpop.eup %4052  ;;  %4066 = vrcp.f32 %v2557_v49 }
 0x54b   : > { %3744 = vmatprep.mubr.msk.bf16.mxu0 %vm974_vm1, %v2665_v28  ;;  %v2640_v37 = vmul.f32 %v4053_v25, %v5110_v52  ;;  %v4055_v39 = vpop.eup %4054 }
 0x54c   : > { %v2563_v47 = vpop.xlane.xlu0 %2562  ;;  %v2560_v19 = vpop.xlane.xlu1 %2559  ;;  %v2641_v44 = vmul.f32 %v4055_v39, %v5112_v61 }
 0x54d   : > { %4068 = vrcp.f32 %v2560_v19  ;;  %v2666_v62 = vpack.c.bf16 %v2640_v37, %v2639_v5 }
 0x54e   : > { %v4057_v41 = vpop.eup %4056  ;;  %4070 = vrcp.f32 %v2563_v47 }
 0x54f   : > { %3745 = vmatmul.mubr.msk.bf16.gmra.mxu0 %vm974_vm1, %v2666_v62  ;;  %v2642_v6 = vmul.f32 %v4057_v41, %v5122_v32  ;;  %v4059_v17 = vpop.eup %4058 }
 0x550   : > { %v2569_v4 = vpop.xlane.xlu0 %2568  ;;  %v2566_v20 = vpop.xlane.xlu1 %2565  ;;  %v2643_v1 = vmul.f32 %v4059_v17, %v5120_v53 }
 0x551   : > { %4072 = vrcp.f32 %v2566_v20  ;;  %v2667_v34 = vpack.c.bf16 %v2642_v6, %v2641_v44 }
 0x552   : > { %v4061_v50 = vpop.eup %4060  ;;  %4074 = vrcp.f32 %v2569_v4 }
 0x553   : > { %3748 = vmatprep.mubr.msk.bf16.mxu0 %vm974_vm1, %v2667_v34  ;;  %v2644_v31 = vmul.f32 %v4061_v50, %v5130_v9  ;;  %v4063_v51 = vpop.eup %4062 }
 0x554   : > { %v2575_v45 = vpop.xlane.xlu0 %2574  ;;  %v2572_v52 = vpop.xlane.xlu1 %2571  ;;  %v2645_v30 = vmul.f32 %v4063_v51, %v5132_v38 }
 0x555   : > { %4076 = vrcp.f32 %v2572_v52  ;;  %v2668_v56 = vpack.c.bf16 %v2644_v31, %v2643_v1 }
 0x556   : > { %v4065_v49 = vpop.eup %4064  ;;  %4078 = vrcp.f32 %v2575_v45 }
 0x557   : > { %3749 = vmatmul.mubr.msk.bf16.gmra.mxu0 %vm974_vm1, %v2668_v56  ;;  %v2646_v36 = vmul.f32 %v4065_v49, %v5142_v40  ;;  %v4067_v35 = vpop.eup %4066 }
 0x558   : > { %v2581_v61 = vpop.xlane.xlu0 %2580  ;;  %v2578_v32 = vpop.xlane.xlu1 %2577  ;;  %v2647_v25 = vmul.f32 %v4067_v35, %v5140_v2  ;;  %v4110_v35 = vmov 0  }
 0x559   : > { %4080 = vrcp.f32 %v2578_v32  ;;  %v2669_v11 = vpack.c.bf16 %v2646_v36, %v2645_v30  ;;  %3789 = vset.pattern.permute.xlu0 %v4110_v35  ;;  %v2940_v35 = vld [vmem:[#allocation2 + $0x80] sm:$0xff] }
 0x55a   : > { %v4069_v28 = vpop.eup %4068  ;;  %4082 = vrcp.f32 %v2581_v61 }
 0x55b   : > { %3752 = vmatprep.mubr.msk.bf16.mxu0 %vm974_vm1, %v2669_v11  ;;  %v2648_v47 = vmul.f32 %v4069_v28, %v5150_v59  ;;  %v4071_v19 = vpop.eup %4070 }
 0x55c   : > { %v2587_v53 = vpop.xlane.xlu0 %2586  ;;  %v2584_v9 = vpop.xlane.xlu1 %2583  ;;  %v2649_v39 = vmul.f32 %v4071_v19, %v5152_v46 }
 0x55d   : > { %4084 = vrcp.f32 %v2584_v9  ;;  %v2670_v5 = vpack.c.bf16 %v2648_v47, %v2647_v25  ;;  %v2926_v9 = vld [vmem:[#allocation2 + $0x10] sm:$0xff]  ;;  %v2927_v25 = vld [vmem:[#allocation2 + $0x18] sm:$0xff] }
 0x55e   : > { %v4073_v37 = vpop.eup %4072  ;;  %4086 = vrcp.f32 %v2587_v53 }
 0x55f   : > { %3753 = vmatmul.mubr.msk.bf16.gmra.mxu0 %vm974_vm1, %v2670_v5  ;;  %v2650_v62 = vmul.f32 %v4073_v37, %v5162_v29  ;;  %v4075_v41 = vpop.eup %4074  ;;  %v2924_v37 = vld [vmem:[#allocation2] sm:$0xff] }
 0x560   : > { %v2593_v38 = vpop.xlane.xlu0 %2592  ;;  %v2590_v40 = vpop.xlane.xlu1 %2589  ;;  %v2651_v59 = vmul.f32 %v4075_v41, %v5160_v60 }
 0x561   : > { %4088 = vrcp.f32 %v2590_v40  ;;  %v2671_v4 = vpack.c.bf16 %v2650_v62, %v2649_v39 }
 0x562   : > { %v4077_v20 = vpop.eup %4076  ;;  %4090 = vrcp.f32 %v2593_v38  ;;  %v2925_v38 = vld [vmem:[#allocation2 + $0x8] sm:$0xff] }
 0x563   : > { %3756 = vmatprep.mubr.msk.bf16.mxu0 %vm974_vm1, %v2671_v4  ;;  %v2652_v44 = vmul.f32 %v4077_v20, %v5169_v13  ;;  %v4079_v6 = vpop.eup %4078 }
 0x564   : > { %v2596_v2 = vpop.xlane.xlu1 %2595  ;;  %v2653_v46 = vmul.f32 %v4079_v6, %v5171_v7 }
 0x565   : > { %4092 = vrcp.f32 %v2596_v2  ;;  %v2672_v17 = vpack.c.bf16 %v2652_v44, %v2651_v59  ;;  %v2930_v59 = vld [vmem:[#allocation2 + $0x30] sm:$0xff]  ;;  %v2931_v44 = vld [vmem:[#allocation2 + $0x38] sm:$0xff] }
 0x566   : > { %v4081_v34 = vpop.eup %4080 }
 0x567   : > { %3757 = vmatmul.mubr.msk.bf16.gmra.mxu0 %vm974_vm1, %v2672_v17  ;;  %v2654_v29 = vmul.f32 %v4081_v34, %v5179_v42  ;;  %v4083_v50 = vpop.eup %4082 }
 0x568   : > { %v2655_v1 = vmul.f32 %v4083_v50, %v5177_v8  ;;  %v2929_v50 = vld [vmem:[#allocation2 + $0x28] sm:$0xff] }
 0x569   : > { %v2673_v45 = vpack.c.bf16 %v2654_v29, %v2653_v46  ;;  %v2928_v29 = vld [vmem:[#allocation2 + $0x20] sm:$0xff] }
 0x56a   : > { %v4085_v52 = vpop.eup %4084 }
 0x56b   : > { %3760 = vmatprep.mubr.msk.bf16.mxu0 %vm974_vm1, %v2673_v45  ;;  %v2656_v60 = vmul.f32 %v4085_v52, %v5185_v26  ;;  %v4087_v13 = vpop.eup %4086  ;;  %v5256_v26 = vld [vmem:[%s5402_s4 + $0x60] sm:$0xf] }
 0x56c   : > { %v2657_v49 = vmul.f32 %v4087_v13, %v5187_v15  ;;  %3526 = vmatprep.mubr.msk.bf16.mxu1 %vm366_vm0, %v5256_v26 }
 0x56d   : > { %v2674_v31 = vpack.c.bf16 %v2656_v60, %v2655_v1 }
 0x56e   : > { %v4089_v51 = vpop.eup %4088 }
 0x56f   : > { %v4091_v56 = vpop.eup %4090  ;;  %3761 = vmatmul.mubr.msk.bf16.gmra.mxu0 %vm974_vm1, %v2674_v31  ;;  %v2658_v7 = vmul.f32 %v4089_v51, %v5195_v22 }
 0x570   : > { %v2659_v32 = vmul.f32 %v4091_v56, %v5193_v14  ;;  %v2989_v14 = vld [vmem:[%s5402_s4 + $0x64] sm:$0xf] }
 0x571   : > { %v2675_v61 = vpack.c.bf16 %v2658_v7, %v2657_v49  ;;  %v2990_v11 = vunpack.c.l.bf16 %v2989_v14 }
 0x572   : > { %v4093_v42 = vpop.eup %4092 }
 0x573   : > { %v2660_v30 = vmul.f32 %v4093_v42, %v5201_v23  ;;  %3764 = vmatprep.mubr.msk.bf16.mxu0 %vm974_vm1, %v2675_v61  ;;  %3009 = vperm.xlu0 %3789, %v2990_v11   ;;  %v2941_v11 = vld [vmem:[#allocation2 + $0x88] sm:$0xff] }
 0x575   : > { %v2676_v8 = vpack.c.bf16 %v2660_v30, %v2659_v32 }
 0x577   : > { %3765 = vmatmul.mubr.msk.bf16.gmra.mxu0 %vm974_vm1, %v2676_v8  ;;  %v2942_v8 = vld [vmem:[#allocation2 + $0x90] sm:$0xff] }
 0x5ff   : > { %v3738_v15 = vpop.f32.mrf.mxu0 }
 0x600   : > { %v2894_v36 = vadd.f32 %v3738_v15, %v4690_v21  ;;  %v2943_v15 = vld [vmem:[#allocation2 + $0x98] sm:$0xff] }
 0x601   : > { %v2765_v22 = vpop.f32.mrf.mxu0 }
 0x602   : > { %v2892_v28 = vadd.f32 %v2765_v22, %v4692_v55  ;;  %v5266_v19 = vadd.f32 %v2926_v9, %v2894_v36 }
 0x603   : > { %v3739_v23 = vpop.f32.mrf.mxu0 }
 0x604   : > { %v2895_v53 = vadd.f32 %v3739_v23, %v4694_v63  ;;  %v5271_v39 = vadd.f32 %v2924_v37, %v2892_v28 }
 0x605   : > { %v2768_v47 = vpop.f32.mrf.mxu0 }
 0x606   : > { %v5268_v5 = vadd.f32 %v2927_v25, %v2895_v53  ;;  %v2893_v21 = vadd.f32 %v2768_v47, %v4698_v58 }
 0x607   : > { %v3742_v40 = vpop.f32.mrf.mxu0 }
 0x608   : > { %v2992_v55 = vpack.c.bf16 %v5268_v5, %v5266_v19  ;;  %v5275_v62 = vadd.f32 %v2925_v38, %v2893_v21  ;;  %v2898_v4 = vadd.f32 %v3742_v40, %v4703_v12 }
 0x609   : > { %v2781_v63 = vpop.f32.mrf.mxu0 }
 0x60a   : > { %v2991_v41 = vpack.c.bf16 %v5275_v62, %v5271_v39  ;;  %v2896_v2 = vadd.f32 %v2781_v63, %v4710_v57  ;;  %v5282_v17 = vadd.f32 %v2930_v59, %v2898_v4 }
 0x60b   : > { %v3743_v20 = vpop.f32.mrf.mxu0 }
 0x60c   : > { %v2899_v58 = vadd.f32 %v3743_v20, %v4716_v43  ;;  %v5289_v52 = vadd.f32 %v2928_v29, %v2896_v2  ;;  %v2939_v20 = vld [vmem:[#allocation2 + $0x78] sm:$0xff] }
 0x60d   : > { %v2784_v6 = vpop.f32.mrf.mxu0 }
 0x60e   : > { %v5284_v34 = vadd.f32 %v2931_v44, %v2899_v58  ;;  %v2897_v46 = vadd.f32 %v2784_v6, %v4721_v33  ;;  %v2938_v44 = vld [vmem:[#allocation2 + $0x70] sm:$0xff] }
 0x60f   : > { %v5287_v45 = vpop.f32.mrf.mxu0 }
 0x610   : > { %v2994_v12 = vpack.c.bf16 %v5284_v34, %v5282_v17  ;;  %v5293_v57 = vadd.f32 %v2929_v50, %v2897_v46  ;;  %v3019_v17 = vsel %vm366_vm0, %v2992_v55, 0  ;;  %v3016_v34 = vsel %vm366_vm0, %v2991_v41, 0 }
 0x611   : > { %v5295_v43 = vpop.f32.mrf.mxu0 }
 0x612   : > { %v2993_v1 = vpack.c.bf16 %v5293_v57, %v5289_v52  ;;  %v3010_v52 = vpop.permute.xlu0 %3009 }
 0x613   : > { %v5299_v60 = vpop.f32.mrf.mxu0 }
 0x615   : > { %v5301_v13 = vpop.f32.mrf.mxu0 }
 0x617   : > { %v3750_v33 = vpop.f32.mrf.mxu0 }
 0x618   : > { %v2906_v4 = vadd.f32 %v3750_v33, %v4746_v3  ;;  %v5492_v33 = vld [vmem:[#allocation36_spill] sm:$0xff] }
 0x619   : > { %v2813_v31 = vpop.f32.mrf.mxu0 }
 0x61a   : > { %v2970_v46 = vadd.f32 %v2938_v44, %v2906_v4  ;;  %v5496_v44 = vld [vmem:[#allocation24_spill] sm:$0xff] }
 0x61b   : > { %v3751_v51 = vpop.f32.mrf.mxu0 }
 0x61c   : > { %v2907_v40 = vadd.f32 %v3751_v51, %v4756_v0 }
 0x61d   : > { %v2816_v56 = vpop.f32.mrf.mxu0 }
 0x61e   : > { %v2971_v58 = vadd.f32 %v2939_v20, %v2907_v40  ;;  %v2936_v20 = vld [vmem:[#allocation2 + $0x60] sm:$0xff] }
 0x61f   : > { %v3754_v49 = vpop.f32.mrf.mxu0 }
 0x620   : > { %v2910_v42 = vadd.f32 %v3754_v49, %v4766_v10  ;;  %v5491_v49 = vld [vmem:[#allocation27_spill] sm:$0xff]  ;;  %v2998_v51 = vpack.c.bf16 %v2971_v58, %v2970_v46  ;;  %v5495_v58 = vld [vmem:[#allocation32_spill] sm:$0xff] }
 0x621   : > { %v2829_v7 = vpop.f32.mrf.mxu0 }
 0x622   : > { %v2908_v32 = vadd.f32 %v2829_v7, %v4771_v27  ;;  %v5306_v36 = vadd.f32 %v2942_v8, %v2910_v42  ;;  %v2905_v7 = vadd.f32 %v2816_v56, %v5491_v49  ;;  %v2954_v42 = vld [vmem:[#allocation2 + $0xf0] sm:$0xff]  ;;  %v2952_v8 = vld [vmem:[#allocation2 + $0xe0] sm:$0xff]  ;;  %v3037_v4 = vsel %vm366_vm0, %v2998_v51, 0 }
 0x623   : > { %v3755_v61 = vpop.f32.mrf.mxu0  ;;  %v5498_v51 = vld [vmem:[#allocation35_spill] sm:$0xff] }
 0x624   : > { %v2911_v30 = vadd.f32 %v3755_v61, %v4778_v16  ;;  %v5313_v53 = vadd.f32 %v2940_v35, %v2908_v32  ;;  %v2955_v61 = vld [vmem:[#allocation2 + $0xf8] sm:$0xff] }
 0x625   : > { %v2832_v22 = vpop.f32.mrf.mxu0 }
 0x626   : > { %v5308_v14 = vadd.f32 %v2943_v15, %v2911_v30  ;;  %v2909_v23 = vadd.f32 %v2832_v22, %v4782_v24  ;;  %v2953_v15 = vld [vmem:[#allocation2 + $0xe8] sm:$0xff] }
 0x627   : > { %v5311_v28 = vpop.f32.mrf.mxu0 }
 0x628   : > { %v3000_v10 = vpack.c.bf16 %v5308_v14, %v5306_v36  ;;  %v5317_v27 = vadd.f32 %v2941_v11, %v2909_v23 }
 0x629   : > { %v5319_v16 = vpop.f32.mrf.mxu0 }
 0x62a   : > { %v2999_v9 = vpack.c.bf16 %v5317_v27, %v5313_v53 }
 0x62b   : > { %v5323_v25 = vpop.f32.mrf.mxu0 }
 0x62d   : > { %v5325_v47 = vpop.f32.mrf.mxu0 }
 0x62f   : > { %v3762_v24 = vpop.f32.mrf.mxu0 }
 0x631   : > { %v2861_v21 = vpop.f32.mrf.mxu0 }
 0x633   : > { %v3763_v37 = vpop.f32.mrf.mxu0 }
 0x635   : > { %v2864_v38 = vpop.f32.mrf.mxu0 }
 0x637   : > { %v3766_v63 = vpop.f32.mrf.mxu0 }
 0x638   : > { %v2922_v59 = vadd.f32 %v3766_v63, %v4828_v48  ;;  %v5493_v48 = vld [vmem:[#allocation26_spill] sm:$0xff] }
 0x639   : > { %v2877_v2 = vpop.f32.mrf.mxu0  ;;  %v2904_v22 = vadd.f32 %v2813_v31, %v5493_v48  ;;  %v2951_v31 = vld [vmem:[#allocation2 + $0xd8] sm:$0xff]  ;;  %v5500_v48 = vld [vmem:[#allocation25_spill] sm:$0xff] }
 0x63a   : > { %v2920_v29 = vadd.f32 %v2877_v2, %v4832_v18  ;;  %v2986_v32 = vadd.f32 %v2954_v42, %v2922_v59  ;;  %v2937_v18 = vld [vmem:[#allocation2 + $0x68] sm:$0xff]  ;;  %v2918_v59 = vadd.f32 %v3762_v24, %v5495_v58  ;;  %v2935_v42 = vld [vmem:[#allocation2 + $0x58] sm:$0xff] }
 0x63b   : > { %v3767_v6 = vpop.f32.mrf.mxu0  ;;  %v2969_v40 = vadd.f32 %v2937_v18, %v2905_v7  ;;  %v2968_v2 = vadd.f32 %v2936_v20, %v2904_v22  ;;  %v2933_v18 = vld [vmem:[#allocation2 + $0x48] sm:$0xff]  ;;  %v2947_v58 = vld [vmem:[#allocation2 + $0xb8] sm:$0xff] }
 0x63c   : > { %v2923_v50 = vadd.f32 %v3767_v6, %v4838_v54  ;;  %v2984_v23 = vadd.f32 %v2952_v8, %v2920_v29  ;;  %v5494_v54 = vld [vmem:[#allocation34_spill] sm:$0xff]  ;;  %v2903_v6 = vadd.f32 %v5299_v60, %v5496_v44  ;;  %v2949_v60 = vld [vmem:[#allocation2 + $0xc8] sm:$0xff] }
 0x63d   : > { %v2880_v0 = vpop.f32.mrf.mxu0  ;;  %v2919_v63 = vadd.f32 %v3763_v37, %v5494_v54  ;;  %v2997_v46 = vpack.c.bf16 %v2969_v40, %v2968_v2  ;;  %v5497_v37 = vld [vmem:[#allocation22_spill] sm:$0xff]  ;;  %v5503_v2 = vld [vmem:[#allocation28_spill] sm:$0xff] }
 0x63e   : > { %v2987_v3 = vadd.f32 %v2955_v61, %v2923_v50  ;;  %v2921_v30 = vadd.f32 %v2880_v0, %v5492_v33  ;;  %v2950_v50 = vld [vmem:[#allocation2 + $0xd0] sm:$0xff]  ;;  %v2902_v49 = vadd.f32 %v5287_v45, %v5497_v37  ;;  %v2967_v61 = vadd.f32 %v2935_v42, %v2903_v6  ;;  %v5502_v54 = vld [vmem:[#allocation30_spill] sm:$0xff] }
 0x63f   : > { %v2983_v29 = vadd.f32 %v2951_v31, %v2919_v63  ;;  %v2982_v7 = vadd.f32 %v2950_v50, %v2918_v59  ;;  %v3034_v24 = vsel %vm366_vm0, %v2997_v46, 0  ;;  %v2901_v45 = vadd.f32 %v5301_v13, %v5500_v48  ;;  %v2946_v31 = vld [vmem:[#allocation2 + $0xb0] sm:$0xff]  ;;  %v5504_v46 = vld [vmem:[#allocation31_spill] sm:$0xff] }
 0x640   : > { %v3006_v35 = vpack.c.bf16 %v2987_v3, %v2986_v32  ;;  %v2985_v11 = vadd.f32 %v2953_v15, %v2921_v30  ;;  %v2917_v32 = vadd.f32 %v2864_v38, %v5498_v51  ;;  %v2934_v3 = vld [vmem:[#allocation2 + $0x50] sm:$0xff]  ;;  %v2915_v63 = vadd.f32 %v5323_v25, %v5502_v54 }
 0x641   : > { %v3004_v0 = vpack.c.bf16 %v2983_v29, %v2982_v7  ;;  %v2966_v33 = vadd.f32 %v2934_v3, %v2902_v49  ;;  %v5499_v30 = vld [vmem:[#allocation33_spill] sm:$0xff]  ;;  %v2965_v40 = vadd.f32 %v2933_v18, %v2901_v45  ;;  %v2914_v13 = vadd.f32 %v5311_v28, %v5503_v2  ;;  %v2945_v28 = vld [vmem:[#allocation2 + $0xa8] sm:$0xff]  ;;  %v2944_v7 = vld [vmem:[#allocation2 + $0xa0] sm:$0xff] }
 0x642   : > { %v3005_v56 = vpack.c.bf16 %v2985_v11, %v2984_v23  ;;  %3772 = vmatprep.subr.msk.bf16.mxu1 %vm366_vm0, %v3006_v35  ;;  %v2916_v8 = vadd.f32 %v2861_v21, %v5499_v30  ;;  %v2981_v22 = vadd.f32 %v2949_v60, %v2917_v32  ;;  %v2948_v23 = vld [vmem:[#allocation2 + $0xc0] sm:$0xff]  ;;  %v2913_v25 = vadd.f32 %v5325_v47, %v5504_v46  ;;  %v5505_v50 = vld [vmem:[#allocation29_spill] sm:$0xff] }
 0x643   : > { %3511 = vmatpush3.bf16.xpose.msra.mxu1 %v3037_v4  ;;  %v2996_v15 = vpack.c.bf16 %v2967_v61, %v2966_v33  ;;  %v5501_v35 = vld [vmem:[#allocation23_spill] sm:$0xff]  ;;  %v2978_v44 = vadd.f32 %v2946_v31, %v2914_v13  ;;  %v2912_v37 = vadd.f32 %v5319_v16, %v5505_v50  ;;  %v3022_v16 = vsel %vm366_vm0, %v2993_v1, 0 }
 0x644   : > { %3773 = vmatprep.subr.msk.bf16.mxu1 %vm366_vm0, %v3005_v56  ;;  %v2900_v11 = vadd.f32 %v5295_v43, %v5501_v35  ;;  %v2980_v38 = vadd.f32 %v2948_v23, %v2916_v8  ;;  %v2932_v4 = vld [vmem:[#allocation2 + $0x40] sm:$0xff]  ;;  %v2979_v43 = vadd.f32 %v2947_v58, %v2915_v63  ;;  %v2977_v49 = vadd.f32 %v2945_v28, %v2913_v25 }
 0x645   : > { %v3031_v21 = vsel %vm366_vm0, %v2996_v15, 0  ;;  %v2976_v42 = vadd.f32 %v2944_v7, %v2912_v37 }
 0x646   : > { %v3003_v56 = vpack.c.bf16 %v2981_v22, %v2980_v38  ;;  %v2964_v20 = vadd.f32 %v2932_v4, %v2900_v11  ;;  %v3002_v6 = vpack.c.bf16 %v2979_v43, %v2978_v44 }
 0x647   : > { %v3001_v61 = vpack.c.bf16 %v2977_v49, %v2976_v42 }
 0x648   : > { %v2995_v59 = vpack.c.bf16 %v2965_v40, %v2964_v20 }
 0x64a   : > { %v3028_v29 = vsel %vm366_vm0, %v2995_v59, 0 }
 0x64b   : > { %3513 = vmatpush3.bf16.xpose.msra.mxu1 %v3034_v24 }
 0x64c   : > { %3774 = vmatprep.subr.msk.bf16.mxu1 %vm366_vm0, %v3004_v0  ;;  %v3025_v0 = vsel %vm366_vm0, %v2994_v12, 0 }
 0x653   : > { %3515 = vmatpush3.bf16.xpose.msra.mxu1 %v3031_v21 }
 0x654   : > { %3775 = vmatprep.subr.msk.bf16.mxu1 %vm366_vm0, %v3003_v56 }
 0x65b   : > { %3517 = vmatpush3.bf16.xpose.msra.mxu1 %v3028_v29 }
 0x65c   : > { %3776 = vmatprep.subr.msk.bf16.mxu1 %vm366_vm0, %v3002_v6 }
 0x663   : > { %3519 = vmatpush3.bf16.xpose.msra.mxu1 %v3025_v0 }
 0x664   : > { %3777 = vmatprep.subr.msk.bf16.mxu1 %vm366_vm0, %v3001_v61 }
 0x66b   : > { %3521 = vmatpush3.bf16.xpose.msra.mxu1 %v3022_v16 }
 0x66c   : > { %3778 = vmatprep.subr.msk.bf16.mxu1 %vm366_vm0, %v3000_v10 }
 0x673   : > { %3523 = vmatpush3.bf16.xpose.msra.mxu1 %v3019_v17 }
 0x674   : > { %3779 = vmatprep.subr.msk.bf16.mxu1 %vm366_vm0, %v2999_v9 }
 0x67b   : > { %3525 = vmatpush3.bf16.xpose.msra.mxu1 %v3016_v34 }
 0x682   : > { %3527 = vmatmul.mubr.msk.bf16.vlgmr.msra.gmra.mxu1 %vm366_vm0, %v5256_v26 }
 0x742   : > { %v3097_v12 = vpop.f32.mrf.mxu1 }
 0x743   : > { %v3098_v19 = vadd.f32 %v3097_v12, %v3010_v52 }
 0x744   : > { %v3099_v5 = vpop.f32.mrf.mxu1 }
 0x745   : > { %v3381_v55 = vmul.f32 -1.442695, %v3098_v19  ;;  %v3100_v57 = vadd.f32 %v3099_v5, %v3010_v52 }
 0x746   : > { %v3101_v1 = vpop.f32.mrf.mxu1 }
 0x747   : > { %4094 = vpow2.f32 %v3381_v55  ;;  %v3382_v36 = vmul.f32 -1.442695, %v3100_v57 }
 0x748   : > { %v3102_v14 = vpop.f32.mrf.mxu1 }
 0x749   : > { %4096 = vpow2.f32 %v3382_v36 }
 0x754   : > { %v4095_v53 = vpop.eup %4094 }
 0x755   : > { %v3110_v39 = vadd.f32 1.0, %v4095_v53 }
 0x756   : > { %v4097_v62 = vpop.eup %4096 }
 0x757   : > { %4098 = vrcp.f32 %v3110_v39  ;;  %v3111_v41 = vadd.f32 1.0, %v4097_v62 }
 0x759   : > { %4100 = vrcp.f32 %v3111_v41 }
 0x764   : > { %v4099_v10 = vpop.eup %4098 }
 0x765   : > { %v3116_v26 = vmax.f32 %v4099_v10, 0.0001 }
 0x766   : > { %v4101_v27 = vpop.eup %4100 }
 0x767   : > { %v3118_v9 = vmin.f32 %v3116_v26, 0.9999  ;;  %v3117_v47 = vmax.f32 %v4101_v27, 0.0001 }
 0x769   : > { %3120 = vst [vmem:[%s284_s16] sm:$0xff] %v3118_v9  ;;  %v3119_v51 = vmin.f32 %v3117_v47, 0.9999 }
 0x76b   : > { %3121 = vst [vmem:[%s284_s16 + $0x8] sm:$0xff] %v3119_v51 }
 0x76c PF: > { %s15_s18 = sadd.s32 1, %s4108_s18  }
 0x76d   : > { %p12_p4 = scmp.ge.s32.totalorder %s15_s18, 4  }
 0x76f   :  { %14 = sbr.rel (!%p12_p4) target bundleno = 1 (0x1), region = 79 }

</bundles_post_ra>
